<compile_context>
chip_gen: v5e
topology: v5e:2x2
jax: 0.10.0
libtpu: 0.0.40
codegen_flags: <defaults>
</compile_context>

<pallas_src>
import functools

import jax
import jax.numpy as jnp
from jax import lax
from jax.experimental import pallas as pl
from jax.experimental.pallas import tpu as pltpu


# ----------------------------------------------------------------------------
# Fused Pallas kernel: all T-1 decoder steps in one program, h carried as the
# fori_loop value (everything VMEM-resident, no per-step grid overhead).
# ----------------------------------------------------------------------------
def fused_decoder_kernel(enc_ref, encsc_ref, h0_ref, vhid_ref,
                         wgi_ref, wgg_ref, wgo_ref,
                         wc_ref, wh_ref,
                         hs_ref):
    B, S, H = enc_ref.shape
    Tm1 = hs_ref.shape[0]

    # ---- loop-invariant loads (stay live across steps) -----------------------
    enc_bf = enc_ref[...]                                  # (B, S, H) bf16
    enc_score = encsc_ref[...]                             # (B, S)    f32
    vhid = vhid_ref[...]                                   # (1, H)    f32
    w_ci, w_cg, w_co = wc_ref[0], wc_ref[1], wc_ref[2]     # (H, H) bf16 each
    w_hi, w_hg, w_ho = wh_ref[0], wh_ref[1], wh_ref[2]     # (H, H) bf16 each

    def step(t, h):
        # ---- folded attention: score = enc.v_enc (precomputed) + h.v_hid ----
        h_term = jnp.sum(h * vhid, axis=1, keepdims=True)          # (B, 1) VPU+XLU
        scores = enc_score + h_term                                 # (B, S)
        scores = scores - jnp.max(scores, axis=1, keepdims=True)
        p = jnp.exp(scores)
        p = p / jnp.sum(p, axis=1, keepdims=True)                   # exact softmax
        # context = sum_s p(b,s) * enc(b,s,:)  as a batched MXU matmul
        context = jnp.einsum(
            'bqs,bsh->bqh', p[:, None, :].astype(jnp.bfloat16), enc_bf,
            preferred_element_type=jnp.float32)[:, 0, :]            # (B, H) f32

        # ---- LSTM cell; forget gate dropped (cell state is always zero in the
        # reference forward, so c_new = i*g and h_new = o * tanh(i*g)) ---------
        ctx_bf = context.astype(jnp.bfloat16)
        h_bf = h.astype(jnp.bfloat16)
        i_pre = (wgi_ref[t]
                 + jnp.dot(ctx_bf, w_ci, preferred_element_type=jnp.float32)
                 + jnp.dot(h_bf, w_hi, preferred_element_type=jnp.float32))
        g_pre = (wgg_ref[t]
                 + jnp.dot(ctx_bf, w_cg, preferred_element_type=jnp.float32)
                 + jnp.dot(h_bf, w_hg, preferred_element_type=jnp.float32))
        o_pre = (wgo_ref[t]
                 + jnp.dot(ctx_bf, w_co, preferred_element_type=jnp.float32)
                 + jnp.dot(h_bf, w_ho, preferred_element_type=jnp.float32))
        i_g = jax.nn.sigmoid(i_pre)                                 # f32 nonlinearities
        g_g = jnp.tanh(g_pre)
        o_g = jax.nn.sigmoid(o_pre)
        h_new = o_g * jnp.tanh(i_g * g_g)

        hs_ref[t] = h_new                                           # per-step hidden out
        return h_new

    lax.fori_loop(0, Tm1, step, h0_ref[...], unroll=True)


def fused_decode(enc_bf, enc_score, h0, v_hid, wg_i, wg_g, wg_o,
                 w_rec_ctx, w_rec_h):
    """Run all T-1 decoder steps; returns per-step hidden states (T-1, B, H)."""
    Tm1, B, H = wg_i.shape
    return pl.pallas_call(
        fused_decoder_kernel,
        out_shape=jax.ShapeDtypeStruct((Tm1, B, H), jnp.float32),
        # no grid: single program, all operands full-array VMEM resident
        compiler_params=pltpu.CompilerParams(
            vmem_limit_bytes=32 * 1024 * 1024),   # raise v5e's 16 MiB scoped default
    )(enc_bf, enc_score, h0, v_hid, wg_i, wg_g, wg_o, w_rec_ctx, w_rec_h)


# ----------------------------------------------------------------------------
# Full forward pass (glue in plain JAX: embedding lookup, hoisted GEMMs, argmax)
# ----------------------------------------------------------------------------
def rnn_decoder_forward(params, encoder_last_hidden_state, encoder_output, targets):
    # encoder_last_hidden_state: (1, B, H); encoder_output: (B, S, H); targets: (B, T)
    h0 = encoder_last_hidden_state[0].astype(jnp.float32)            # (B, H)
    B, S, H = encoder_output.shape
    T = targets.shape[1]
    Tm1 = T - 1
    O = params["w_out"].shape[1]
    W = params["embedding"].shape[1]

    # teacher-forced word inputs; hoisted word-gate GEMM (i, g, o only)
    emb = params["embedding"][targets[:, :Tm1]]                       # (B, Tm1, W)
    wg = emb.reshape(B * Tm1, W) @ params["w_ih_word"] + params["b_igo"]   # (B*Tm1, 3H)
    wg = wg.reshape(B, Tm1, 3 * H)
    wg_i = jnp.transpose(wg[:, :, 0 * H:1 * H], (1, 0, 2))            # (Tm1, B, H)
    wg_g = jnp.transpose(wg[:, :, 1 * H:2 * H], (1, 0, 2))
    wg_o = jnp.transpose(wg[:, :, 2 * H:3 * H], (1, 0, 2))

    # folded attention: per-(b, s) encoder score term, computed once
    enc_score = jnp.einsum('bsh,h->bs',
                           encoder_output.astype(jnp.float32), params["v_enc"])

    hs = fused_decode(encoder_output.astype(jnp.bfloat16), enc_score, h0,
                      params["v_hid"], wg_i, wg_g, wg_o,
                      params["w_rec_ctx"], params["w_rec_h"])          # (Tm1, B, H)

    # output projection hoisted out of the kernel: one GEMM over (T-1)*B rows
    logits = hs.reshape(Tm1 * B, H) @ params["w_out"] + params["b_out"]     # (Tm1*B, O)
    seq_logprob = jnp.transpose(logits.reshape(Tm1, B, O), (1, 0, 2))       # (B, Tm1, O)
    seq_predictions = jnp.argmax(seq_logprob, axis=2)                       # (B, Tm1)
    return seq_logprob, seq_predictions


# ----------------------------------------------------------------------------
# Deterministic synthetic parameters (shapes follow the module __init__)
# ----------------------------------------------------------------------------
def init_params(key, hidden_size, output_size, word_dim):
    # NOTE: the reference hard-codes nn.Embedding(output_size, 1024) and
    # hidden_size=512; here they are parametrized small for the test.
    ks = jax.random.split(key, 16)
    n = lambda k, shape, scale=0.1: (scale * jax.random.normal(k, shape)).astype(jnp.float32)
    H, O, W = hidden_size, output_size, word_dim
    return {
        "embedding": n(ks[0], (O, W)),
        # attention (weights stored pre-transposed to (in, out))
        "w1": n(ks[1], (2 * H, H)), "b1": n(ks[2], (1, H)),
        "w2": n(ks[3], (H, H)),     "b2": n(ks[4], (1, H)),
        "w3": n(ks[5], (H, H)),     "b3": n(ks[6], (1, H)),
        "w4": n(ks[7], (H, H)),     "b4": n(ks[8], (1, H)),
        "w_attn": n(ks[9], (H, 1)),
        # LSTM (input = word_dim + hidden), weights pre-transposed to (in, 4H), gate order i,f,g,o
        "w_ih": n(ks[10], (W + H, 4 * H)), "b_ih": n(ks[11], (1, 4 * H)),
        "w_hh": n(ks[12], (H, 4 * H)),     "b_hh": n(ks[13], (1, 4 * H)),
        # output projection
        "w_out": n(ks[14], (H, O)), "b_out": n(ks[15], (1, O)),
    }


def prepare_params(raw, word_dim):
    """Re-pack raw f32 params into kernel-friendly form."""
    H = raw["w2"].shape[0]
    W = word_dim
    bf = lambda a: a.astype(jnp.bfloat16)

    # ---- fold the activation-free attention chain (algebraically exact; the
    # bias contribution is constant over (b, s), hence softmax-invariant) ------
    m = raw["w2"] @ raw["w3"] @ raw["w4"] @ raw["w_attn"]             # (H, 1)
    v_enc = (raw["w1"][:H, :] @ m).reshape(H)                         # (H,)   enc half of W1
    v_hid = (raw["w1"][H:, :] @ m).reshape(1, H)                      # (1, H) hid half of W1

    # ---- LSTM: drop the dead forget gate (c == 0 always in the reference
    # forward), keep (i, g, o); split word / context / hidden weight parts -----
    gate_cols = (slice(0, H), slice(2 * H, 3 * H), slice(3 * H, 4 * H))   # i, g, o
    w_ih, w_hh = raw["w_ih"], raw["w_hh"]
    b_all = raw["b_ih"] + raw["b_hh"]                                 # (1, 4H) folded biases
    w_ih_word = jnp.concatenate([w_ih[:W, c] for c in gate_cols], axis=1)   # (W, 3H)
    b_igo = jnp.concatenate([b_all[:, c] for c in gate_cols], axis=1)       # (1, 3H)
    w_rec_ctx = bf(jnp.stack([w_ih[W:, c] for c in gate_cols], axis=0))     # (3, H, H)
    w_rec_h = bf(jnp.stack([w_hh[:, c] for c in gate_cols], axis=0))        # (3, H, H)

    return {
        "embedding": raw["embedding"],
        "v_enc": v_enc, "v_hid": v_hid,
        "w_ih_word": w_ih_word, "b_igo": b_igo,
        "w_rec_ctx": w_rec_ctx, "w_rec_h": w_rec_h,
        "w_out": raw["w_out"], "b_out": raw["b_out"],
    }


if __name__ == "__main__":
    B, S, H, W, O, T = 2, 8, 32, 64, 16, 8   # batch, enc seq, hidden, word_dim, vocab, target len

    key = jax.random.PRNGKey(0)
    k_params, k_h, k_enc, k_tgt = jax.random.split(key, 4)

    raw_params = init_params(k_params, hidden_size=H, output_size=O, word_dim=W)
    params = prepare_params(raw_params, word_dim=W)

    encoder_last_hidden_state = (0.1 * jax.random.normal(k_h, (1, B, H))).astype(jnp.float32)
    encoder_output = (0.1 * jax.random.normal(k_enc, (B, S, H))).astype(jnp.float32)
    targets = jax.random.randint(k_tgt, (B, T), 0, O, dtype=jnp.int32)

    fwd = jax.jit(functools.partial(rnn_decoder_forward, params))
    seq_logprob, seq_predictions = fwd(encoder_last_hidden_state, encoder_output, targets)
    jax.block_until_ready((seq_logprob, seq_predictions))

    assert seq_logprob.shape == (B, T - 1, O)
    assert seq_predictions.shape == (B, T - 1)
    assert bool(jnp.all(jnp.isfinite(seq_logprob)))
    print("KERNEL_OK")
</pallas_src>

<mosaic_0001>
module attributes {stable_mosaic.version = 11 : i64} {
  func.func @fused_decoder_kernel(%arg0: memref<2x8x32xbf16, #tpu.memory_space<vmem>>, %arg1: memref<2x8xf32, #tpu.memory_space<vmem>>, %arg2: memref<2x32xf32, #tpu.memory_space<vmem>>, %arg3: memref<1x32xf32, #tpu.memory_space<vmem>>, %arg4: memref<7x2x32xf32, #tpu.memory_space<vmem>>, %arg5: memref<7x2x32xf32, #tpu.memory_space<vmem>>, %arg6: memref<7x2x32xf32, #tpu.memory_space<vmem>>, %arg7: memref<3x32x32xbf16, #tpu.memory_space<vmem>>, %arg8: memref<3x32x32xbf16, #tpu.memory_space<vmem>>, %arg9: memref<7x2x32xf32, #tpu.memory_space<vmem>>) attributes {dimension_semantics = [], scalar_prefetch = 0 : i64, scratch_operands = 0 : i64, tpu.core_type = #tpu.core_type<tc>} {
    %c0 = arith.constant 0 : index
    %c0_0 = arith.constant 0 : index
    %c0_1 = arith.constant 0 : index
    %0 = vector.load %arg0[%c0, %c0_0, %c0_1] : memref<2x8x32xbf16, #tpu.memory_space<vmem>>, vector<2x8x32xbf16>
    %c0_2 = arith.constant 0 : index
    %c0_3 = arith.constant 0 : index
    %1 = vector.load %arg1[%c0_2, %c0_3] : memref<2x8xf32, #tpu.memory_space<vmem>>, vector<2x8xf32>
    %c0_4 = arith.constant 0 : index
    %c0_5 = arith.constant 0 : index
    %2 = vector.load %arg3[%c0_4, %c0_5] : memref<1x32xf32, #tpu.memory_space<vmem>>, vector<1x32xf32>
    %c0_6 = arith.constant 0 : index
    %c0_7 = arith.constant 0 : index
    %c0_8 = arith.constant 0 : index
    %3 = vector.load %arg7[%c0_6, %c0_7, %c0_8] : memref<3x32x32xbf16, #tpu.memory_space<vmem>>, vector<1x32x32xbf16>
    %4 = vector.shape_cast %3 : vector<1x32x32xbf16> to vector<32x32xbf16>
    %c1 = arith.constant 1 : index
    %c0_9 = arith.constant 0 : index
    %c0_10 = arith.constant 0 : index
    %5 = vector.load %arg7[%c1, %c0_9, %c0_10] : memref<3x32x32xbf16, #tpu.memory_space<vmem>>, vector<1x32x32xbf16>
    %6 = vector.shape_cast %5 : vector<1x32x32xbf16> to vector<32x32xbf16>
    %c2 = arith.constant 2 : index
    %c0_11 = arith.constant 0 : index
    %c0_12 = arith.constant 0 : index
    %7 = vector.load %arg7[%c2, %c0_11, %c0_12] : memref<3x32x32xbf16, #tpu.memory_space<vmem>>, vector<1x32x32xbf16>
    %8 = vector.shape_cast %7 : vector<1x32x32xbf16> to vector<32x32xbf16>
    %c0_13 = arith.constant 0 : index
    %c0_14 = arith.constant 0 : index
    %c0_15 = arith.constant 0 : index
    %9 = vector.load %arg8[%c0_13, %c0_14, %c0_15] : memref<3x32x32xbf16, #tpu.memory_space<vmem>>, vector<1x32x32xbf16>
    %10 = vector.shape_cast %9 : vector<1x32x32xbf16> to vector<32x32xbf16>
    %c1_16 = arith.constant 1 : index
    %c0_17 = arith.constant 0 : index
    %c0_18 = arith.constant 0 : index
    %11 = vector.load %arg8[%c1_16, %c0_17, %c0_18] : memref<3x32x32xbf16, #tpu.memory_space<vmem>>, vector<1x32x32xbf16>
    %12 = vector.shape_cast %11 : vector<1x32x32xbf16> to vector<32x32xbf16>
    %c2_19 = arith.constant 2 : index
    %c0_20 = arith.constant 0 : index
    %c0_21 = arith.constant 0 : index
    %13 = vector.load %arg8[%c2_19, %c0_20, %c0_21] : memref<3x32x32xbf16, #tpu.memory_space<vmem>>, vector<1x32x32xbf16>
    %14 = vector.shape_cast %13 : vector<1x32x32xbf16> to vector<32x32xbf16>
    %c0_22 = arith.constant 0 : index
    %c0_23 = arith.constant 0 : index
    %15 = vector.load %arg2[%c0_22, %c0_23] : memref<2x32xf32, #tpu.memory_space<vmem>>, vector<2x32xf32>
    %c0_i32 = arith.constant 0 : i32
    %16 = vector.broadcast %2 : vector<1x32xf32> to vector<2x32xf32>
    %17 = arith.mulf %15, %16 : vector<2x32xf32>
    %cst = arith.constant dense<0.000000e+00> : vector<2xf32>
    %18 = vector.multi_reduction <add>, %17, %cst [1] : vector<2x32xf32> to vector<2xf32>
    %19 = vector.shape_cast %18 : vector<2xf32> to vector<2x1xf32>
    %20 = vector.broadcast %19 : vector<2x1xf32> to vector<2x8xf32>
    %21 = arith.addf %1, %20 : vector<2x8xf32>
    %cst_24 = arith.constant dense<0xFF800000> : vector<2xf32>
    %22 = vector.multi_reduction <maximumf>, %21, %cst_24 [1] : vector<2x8xf32> to vector<2xf32>
    %23 = vector.shape_cast %22 : vector<2xf32> to vector<2x1xf32>
    %24 = vector.broadcast %23 : vector<2x1xf32> to vector<2x8xf32>
    %25 = arith.subf %21, %24 : vector<2x8xf32>
    %26 = math.exp %25 : vector<2x8xf32>
    %cst_25 = arith.constant dense<0.000000e+00> : vector<2xf32>
    %27 = vector.multi_reduction <add>, %26, %cst_25 [1] : vector<2x8xf32> to vector<2xf32>
    %28 = vector.shape_cast %27 : vector<2xf32> to vector<2x1xf32>
    %29 = vector.broadcast %28 : vector<2x1xf32> to vector<2x8xf32>
    %30 = arith.divf %26, %29 : vector<2x8xf32>
    %31 = vector.shape_cast %30 : vector<2x8xf32> to vector<2x1x8xf32>
    %32 = arith.truncf %31 : vector<2x1x8xf32> to vector<2x1x8xbf16>
    "tpu.trace_start"() <{level = 10 : i32, message = "bqs,bsh->bqh"}> : () -> ()
    %cst_26 = arith.constant dense<0.000000e+00> : vector<2x1x32xf32>
    %33 = tpu.matmul %32, %0, %cst_26 {dimension_numbers = #tpu.dot_dimension_numbers<[2], [1], [1], [2], [0, 0, 0, 1, 1, 2], [0], [0]>} : vector<2x1x8xbf16>, vector<2x8x32xbf16>, vector<2x1x32xf32> -> vector<2x1x32xf32>
    "tpu.trace_stop"() : () -> ()
    %34 = vector.shape_cast %33 : vector<2x1x32xf32> to vector<2x32xf32>
    %35 = arith.truncf %34 : vector<2x32xf32> to vector<2x32xbf16>
    %36 = arith.truncf %15 : vector<2x32xf32> to vector<2x32xbf16>
    %37 = arith.index_cast %c0_i32 : i32 to index
    %c0_27 = arith.constant 0 : index
    %c0_28 = arith.constant 0 : index
    %38 = vector.load %arg4[%37, %c0_27, %c0_28] : memref<7x2x32xf32, #tpu.memory_space<vmem>>, vector<1x2x32xf32>
    %39 = vector.shape_cast %38 : vector<1x2x32xf32> to vector<2x32xf32>
    %cst_29 = arith.constant dense<0.000000e+00> : vector<2x32xf32>
    %40 = tpu.matmul %35, %4, %cst_29 {dimension_numbers = #tpu.dot_dimension_numbers<[1], [0], [0], [1], [0, 0, 1, 1], [], []>} : vector<2x32xbf16>, vector<32x32xbf16>, vector<2x32xf32> -> vector<2x32xf32>
    %41 = arith.addf %39, %40 : vector<2x32xf32>
    %cst_30 = arith.constant dense<0.000000e+00> : vector<2x32xf32>
    %42 = tpu.matmul %36, %10, %cst_30 {dimension_numbers = #tpu.dot_dimension_numbers<[1], [0], [0], [1], [0, 0, 1, 1], [], []>} : vector<2x32xbf16>, vector<32x32xbf16>, vector<2x32xf32> -> vector<2x32xf32>
    %43 = arith.addf %41, %42 : vector<2x32xf32>
    %44 = arith.index_cast %c0_i32 : i32 to index
    %c0_31 = arith.constant 0 : index
    %c0_32 = arith.constant 0 : index
    %45 = vector.load %arg5[%44, %c0_31, %c0_32] : memref<7x2x32xf32, #tpu.memory_space<vmem>>, vector<1x2x32xf32>
    %46 = vector.shape_cast %45 : vector<1x2x32xf32> to vector<2x32xf32>
    %cst_33 = arith.constant dense<0.000000e+00> : vector<2x32xf32>
    %47 = tpu.matmul %35, %6, %cst_33 {dimension_numbers = #tpu.dot_dimension_numbers<[1], [0], [0], [1], [0, 0, 1, 1], [], []>} : vector<2x32xbf16>, vector<32x32xbf16>, vector<2x32xf32> -> vector<2x32xf32>
    %48 = arith.addf %46, %47 : vector<2x32xf32>
    %cst_34 = arith.constant dense<0.000000e+00> : vector<2x32xf32>
    %49 = tpu.matmul %36, %12, %cst_34 {dimension_numbers = #tpu.dot_dimension_numbers<[1], [0], [0], [1], [0, 0, 1, 1], [], []>} : vector<2x32xbf16>, vector<32x32xbf16>, vector<2x32xf32> -> vector<2x32xf32>
    %50 = arith.addf %48, %49 : vector<2x32xf32>
    %51 = arith.index_cast %c0_i32 : i32 to index
    %c0_35 = arith.constant 0 : index
    %c0_36 = arith.constant 0 : index
    %52 = vector.load %arg6[%51, %c0_35, %c0_36] : memref<7x2x32xf32, #tpu.memory_space<vmem>>, vector<1x2x32xf32>
    %53 = vector.shape_cast %52 : vector<1x2x32xf32> to vector<2x32xf32>
    %cst_37 = arith.constant dense<0.000000e+00> : vector<2x32xf32>
    %54 = tpu.matmul %35, %8, %cst_37 {dimension_numbers = #tpu.dot_dimension_numbers<[1], [0], [0], [1], [0, 0, 1, 1], [], []>} : vector<2x32xbf16>, vector<32x32xbf16>, vector<2x32xf32> -> vector<2x32xf32>
    %55 = arith.addf %53, %54 : vector<2x32xf32>
    %cst_38 = arith.constant dense<0.000000e+00> : vector<2x32xf32>
    %56 = tpu.matmul %36, %14, %cst_38 {dimension_numbers = #tpu.dot_dimension_numbers<[1], [0], [0], [1], [0, 0, 1, 1], [], []>} : vector<2x32xbf16>, vector<32x32xbf16>, vector<2x32xf32> -> vector<2x32xf32>
    %57 = arith.addf %55, %56 : vector<2x32xf32>
    %58 = arith.negf %43 : vector<2x32xf32>
    %59 = math.exp %58 : vector<2x32xf32>
    %cst_39 = arith.constant 1.000000e+00 : f32
    %60 = vector.broadcast %cst_39 : f32 to vector<2x32xf32>
    %61 = arith.addf %60, %59 : vector<2x32xf32>
    %62 = arith.divf %60, %61 : vector<2x32xf32>
    %63 = math.tanh %50 : vector<2x32xf32>
    %64 = arith.negf %57 : vector<2x32xf32>
    %65 = math.exp %64 : vector<2x32xf32>
    %cst_40 = arith.constant 1.000000e+00 : f32
    %66 = vector.broadcast %cst_40 : f32 to vector<2x32xf32>
    %67 = arith.addf %66, %65 : vector<2x32xf32>
    %68 = arith.divf %66, %67 : vector<2x32xf32>
    %69 = arith.mulf %62, %63 : vector<2x32xf32>
    %70 = math.tanh %69 : vector<2x32xf32>
    %71 = arith.mulf %68, %70 : vector<2x32xf32>
    %72 = arith.index_cast %c0_i32 : i32 to index
    %c0_41 = arith.constant 0 : index
    %c0_42 = arith.constant 0 : index
    %73 = vector.load %arg9[%72, %c0_41, %c0_42] : memref<7x2x32xf32, #tpu.memory_space<vmem>>, vector<1x2x32xf32>
    %74 = vector.shape_cast %73 : vector<1x2x32xf32> to vector<2x32xf32>
    %75 = vector.shape_cast %71 : vector<2x32xf32> to vector<1x2x32xf32>
    tpu.vector_store %arg9[%72, %c0_41, %c0_42], %75 {strides = array<i32>} : memref<7x2x32xf32, #tpu.memory_space<vmem>>, vector<1x2x32xf32>,
    %c1_i32 = arith.constant 1 : i32
    %76 = vector.broadcast %2 : vector<1x32xf32> to vector<2x32xf32>
    %77 = arith.mulf %71, %76 : vector<2x32xf32>
    %cst_43 = arith.constant dense<0.000000e+00> : vector<2xf32>
    %78 = vector.multi_reduction <add>, %77, %cst_43 [1] : vector<2x32xf32> to vector<2xf32>
    %79 = vector.shape_cast %78 : vector<2xf32> to vector<2x1xf32>
    %80 = vector.broadcast %79 : vector<2x1xf32> to vector<2x8xf32>
    %81 = arith.addf %1, %80 : vector<2x8xf32>
    %cst_44 = arith.constant dense<0xFF800000> : vector<2xf32>
    %82 = vector.multi_reduction <maximumf>, %81, %cst_44 [1] : vector<2x8xf32> to vector<2xf32>
    %83 = vector.shape_cast %82 : vector<2xf32> to vector<2x1xf32>
    %84 = vector.broadcast %83 : vector<2x1xf32> to vector<2x8xf32>
    %85 = arith.subf %81, %84 : vector<2x8xf32>
    %86 = math.exp %85 : vector<2x8xf32>
    %cst_45 = arith.constant dense<0.000000e+00> : vector<2xf32>
    %87 = vector.multi_reduction <add>, %86, %cst_45 [1] : vector<2x8xf32> to vector<2xf32>
    %88 = vector.shape_cast %87 : vector<2xf32> to vector<2x1xf32>
    %89 = vector.broadcast %88 : vector<2x1xf32> to vector<2x8xf32>
    %90 = arith.divf %86, %89 : vector<2x8xf32>
    %91 = vector.shape_cast %90 : vector<2x8xf32> to vector<2x1x8xf32>
    %92 = arith.truncf %91 : vector<2x1x8xf32> to vector<2x1x8xbf16>
    "tpu.trace_start"() <{level = 10 : i32, message = "bqs,bsh->bqh"}> : () -> ()
    %cst_46 = arith.constant dense<0.000000e+00> : vector<2x1x32xf32>
    %93 = tpu.matmul %92, %0, %cst_46 {dimension_numbers = #tpu.dot_dimension_numbers<[2], [1], [1], [2], [0, 0, 0, 1, 1, 2], [0], [0]>} : vector<2x1x8xbf16>, vector<2x8x32xbf16>, vector<2x1x32xf32> -> vector<2x1x32xf32>
    "tpu.trace_stop"() : () -> ()
    %94 = vector.shape_cast %93 : vector<2x1x32xf32> to vector<2x32xf32>
    %95 = arith.truncf %94 : vector<2x32xf32> to vector<2x32xbf16>
    %96 = arith.truncf %71 : vector<2x32xf32> to vector<2x32xbf16>
    %97 = arith.index_cast %c1_i32 : i32 to index
    %c0_47 = arith.constant 0 : index
    %c0_48 = arith.constant 0 : index
    %98 = vector.load %arg4[%97, %c0_47, %c0_48] : memref<7x2x32xf32, #tpu.memory_space<vmem>>, vector<1x2x32xf32>
    %99 = vector.shape_cast %98 : vector<1x2x32xf32> to vector<2x32xf32>
    %cst_49 = arith.constant dense<0.000000e+00> : vector<2x32xf32>
    %100 = tpu.matmul %95, %4, %cst_49 {dimension_numbers = #tpu.dot_dimension_numbers<[1], [0], [0], [1], [0, 0, 1, 1], [], []>} : vector<2x32xbf16>, vector<32x32xbf16>, vector<2x32xf32> -> vector<2x32xf32>
    %101 = arith.addf %99, %100 : vector<2x32xf32>
    %cst_50 = arith.constant dense<0.000000e+00> : vector<2x32xf32>
    %102 = tpu.matmul %96, %10, %cst_50 {dimension_numbers = #tpu.dot_dimension_numbers<[1], [0], [0], [1], [0, 0, 1, 1], [], []>} : vector<2x32xbf16>, vector<32x32xbf16>, vector<2x32xf32> -> vector<2x32xf32>
    %103 = arith.addf %101, %102 : vector<2x32xf32>
    %104 = arith.index_cast %c1_i32 : i32 to index
    %c0_51 = arith.constant 0 : index
    %c0_52 = arith.constant 0 : index
    %105 = vector.load %arg5[%104, %c0_51, %c0_52] : memref<7x2x32xf32, #tpu.memory_space<vmem>>, vector<1x2x32xf32>
    %106 = vector.shape_cast %105 : vector<1x2x32xf32> to vector<2x32xf32>
    %cst_53 = arith.constant dense<0.000000e+00> : vector<2x32xf32>
    %107 = tpu.matmul %95, %6, %cst_53 {dimension_numbers = #tpu.dot_dimension_numbers<[1], [0], [0], [1], [0, 0, 1, 1], [], []>} : vector<2x32xbf16>, vector<32x32xbf16>, vector<2x32xf32> -> vector<2x32xf32>
    %108 = arith.addf %106, %107 : vector<2x32xf32>
    %cst_54 = arith.constant dense<0.000000e+00> : vector<2x32xf32>
    %109 = tpu.matmul %96, %12, %cst_54 {dimension_numbers = #tpu.dot_dimension_numbers<[1], [0], [0], [1], [0, 0, 1, 1], [], []>} : vector<2x32xbf16>, vector<32x32xbf16>, vector<2x32xf32> -> vector<2x32xf32>
    %110 = arith.addf %108, %109 : vector<2x32xf32>
    %111 = arith.index_cast %c1_i32 : i32 to index
    %c0_55 = arith.constant 0 : index
    %c0_56 = arith.constant 0 : index
    %112 = vector.load %arg6[%111, %c0_55, %c0_56] : memref<7x2x32xf32, #tpu.memory_space<vmem>>, vector<1x2x32xf32>
    %113 = vector.shape_cast %112 : vector<1x2x32xf32> to vector<2x32xf32>
    %cst_57 = arith.constant dense<0.000000e+00> : vector<2x32xf32>
    %114 = tpu.matmul %95, %8, %cst_57 {dimension_numbers = #tpu.dot_dimension_numbers<[1], [0], [0], [1], [0, 0, 1, 1], [], []>} : vector<2x32xbf16>, vector<32x32xbf16>, vector<2x32xf32> -> vector<2x32xf32>
    %115 = arith.addf %113, %114 : vector<2x32xf32>
    %cst_58 = arith.constant dense<0.000000e+00> : vector<2x32xf32>
    %116 = tpu.matmul %96, %14, %cst_58 {dimension_numbers = #tpu.dot_dimension_numbers<[1], [0], [0], [1], [0, 0, 1, 1], [], []>} : vector<2x32xbf16>, vector<32x32xbf16>, vector<2x32xf32> -> vector<2x32xf32>
    %117 = arith.addf %115, %116 : vector<2x32xf32>
    %118 = arith.negf %103 : vector<2x32xf32>
    %119 = math.exp %118 : vector<2x32xf32>
    %cst_59 = arith.constant 1.000000e+00 : f32
    %120 = vector.broadcast %cst_59 : f32 to vector<2x32xf32>
    %121 = arith.addf %120, %119 : vector<2x32xf32>
    %122 = arith.divf %120, %121 : vector<2x32xf32>
    %123 = math.tanh %110 : vector<2x32xf32>
    %124 = arith.negf %117 : vector<2x32xf32>
    %125 = math.exp %124 : vector<2x32xf32>
    %cst_60 = arith.constant 1.000000e+00 : f32
    %126 = vector.broadcast %cst_60 : f32 to vector<2x32xf32>
    %127 = arith.addf %126, %125 : vector<2x32xf32>
    %128 = arith.divf %126, %127 : vector<2x32xf32>
    %129 = arith.mulf %122, %123 : vector<2x32xf32>
    %130 = math.tanh %129 : vector<2x32xf32>
    %131 = arith.mulf %128, %130 : vector<2x32xf32>
    %132 = arith.index_cast %c1_i32 : i32 to index
    %c0_61 = arith.constant 0 : index
    %c0_62 = arith.constant 0 : index
    %133 = vector.load %arg9[%132, %c0_61, %c0_62] : memref<7x2x32xf32, #tpu.memory_space<vmem>>, vector<1x2x32xf32>
    %134 = vector.shape_cast %133 : vector<1x2x32xf32> to vector<2x32xf32>
    %135 = vector.shape_cast %131 : vector<2x32xf32> to vector<1x2x32xf32>
    tpu.vector_store %arg9[%132, %c0_61, %c0_62], %135 {strides = array<i32>} : memref<7x2x32xf32, #tpu.memory_space<vmem>>, vector<1x2x32xf32>,
    %c2_i32 = arith.constant 2 : i32
    %136 = vector.broadcast %2 : vector<1x32xf32> to vector<2x32xf32>
    %137 = arith.mulf %131, %136 : vector<2x32xf32>
    %cst_63 = arith.constant dense<0.000000e+00> : vector<2xf32>
    %138 = vector.multi_reduction <add>, %137, %cst_63 [1] : vector<2x32xf32> to vector<2xf32>
    %139 = vector.shape_cast %138 : vector<2xf32> to vector<2x1xf32>
    %140 = vector.broadcast %139 : vector<2x1xf32> to vector<2x8xf32>
    %141 = arith.addf %1, %140 : vector<2x8xf32>
    %cst_64 = arith.constant dense<0xFF800000> : vector<2xf32>
    %142 = vector.multi_reduction <maximumf>, %141, %cst_64 [1] : vector<2x8xf32> to vector<2xf32>
    %143 = vector.shape_cast %142 : vector<2xf32> to vector<2x1xf32>
    %144 = vector.broadcast %143 : vector<2x1xf32> to vector<2x8xf32>
    %145 = arith.subf %141, %144 : vector<2x8xf32>
    %146 = math.exp %145 : vector<2x8xf32>
    %cst_65 = arith.constant dense<0.000000e+00> : vector<2xf32>
    %147 = vector.multi_reduction <add>, %146, %cst_65 [1] : vector<2x8xf32> to vector<2xf32>
    %148 = vector.shape_cast %147 : vector<2xf32> to vector<2x1xf32>
    %149 = vector.broadcast %148 : vector<2x1xf32> to vector<2x8xf32>
    %150 = arith.divf %146, %149 : vector<2x8xf32>
    %151 = vector.shape_cast %150 : vector<2x8xf32> to vector<2x1x8xf32>
    %152 = arith.truncf %151 : vector<2x1x8xf32> to vector<2x1x8xbf16>
    "tpu.trace_start"() <{level = 10 : i32, message = "bqs,bsh->bqh"}> : () -> ()
    %cst_66 = arith.constant dense<0.000000e+00> : vector<2x1x32xf32>
    %153 = tpu.matmul %152, %0, %cst_66 {dimension_numbers = #tpu.dot_dimension_numbers<[2], [1], [1], [2], [0, 0, 0, 1, 1, 2], [0], [0]>} : vector<2x1x8xbf16>, vector<2x8x32xbf16>, vector<2x1x32xf32> -> vector<2x1x32xf32>
    "tpu.trace_stop"() : () -> ()
    %154 = vector.shape_cast %153 : vector<2x1x32xf32> to vector<2x32xf32>
    %155 = arith.truncf %154 : vector<2x32xf32> to vector<2x32xbf16>
    %156 = arith.truncf %131 : vector<2x32xf32> to vector<2x32xbf16>
    %157 = arith.index_cast %c2_i32 : i32 to index
    %c0_67 = arith.constant 0 : index
    %c0_68 = arith.constant 0 : index
    %158 = vector.load %arg4[%157, %c0_67, %c0_68] : memref<7x2x32xf32, #tpu.memory_space<vmem>>, vector<1x2x32xf32>
    %159 = vector.shape_cast %158 : vector<1x2x32xf32> to vector<2x32xf32>
    %cst_69 = arith.constant dense<0.000000e+00> : vector<2x32xf32>
    %160 = tpu.matmul %155, %4, %cst_69 {dimension_numbers = #tpu.dot_dimension_numbers<[1], [0], [0], [1], [0, 0, 1, 1], [], []>} : vector<2x32xbf16>, vector<32x32xbf16>, vector<2x32xf32> -> vector<2x32xf32>
    %161 = arith.addf %159, %160 : vector<2x32xf32>
    %cst_70 = arith.constant dense<0.000000e+00> : vector<2x32xf32>
    %162 = tpu.matmul %156, %10, %cst_70 {dimension_numbers = #tpu.dot_dimension_numbers<[1], [0], [0], [1], [0, 0, 1, 1], [], []>} : vector<2x32xbf16>, vector<32x32xbf16>, vector<2x32xf32> -> vector<2x32xf32>
    %163 = arith.addf %161, %162 : vector<2x32xf32>
    %164 = arith.index_cast %c2_i32 : i32 to index
    %c0_71 = arith.constant 0 : index
    %c0_72 = arith.constant 0 : index
    %165 = vector.load %arg5[%164, %c0_71, %c0_72] : memref<7x2x32xf32, #tpu.memory_space<vmem>>, vector<1x2x32xf32>
    %166 = vector.shape_cast %165 : vector<1x2x32xf32> to vector<2x32xf32>
    %cst_73 = arith.constant dense<0.000000e+00> : vector<2x32xf32>
    %167 = tpu.matmul %155, %6, %cst_73 {dimension_numbers = #tpu.dot_dimension_numbers<[1], [0], [0], [1], [0, 0, 1, 1], [], []>} : vector<2x32xbf16>, vector<32x32xbf16>, vector<2x32xf32> -> vector<2x32xf32>
    %168 = arith.addf %166, %167 : vector<2x32xf32>
    %cst_74 = arith.constant dense<0.000000e+00> : vector<2x32xf32>
    %169 = tpu.matmul %156, %12, %cst_74 {dimension_numbers = #tpu.dot_dimension_numbers<[1], [0], [0], [1], [0, 0, 1, 1], [], []>} : vector<2x32xbf16>, vector<32x32xbf16>, vector<2x32xf32> -> vector<2x32xf32>
    %170 = arith.addf %168, %169 : vector<2x32xf32>
    %171 = arith.index_cast %c2_i32 : i32 to index
    %c0_75 = arith.constant 0 : index
    %c0_76 = arith.constant 0 : index
    %172 = vector.load %arg6[%171, %c0_75, %c0_76] : memref<7x2x32xf32, #tpu.memory_space<vmem>>, vector<1x2x32xf32>
    %173 = vector.shape_cast %172 : vector<1x2x32xf32> to vector<2x32xf32>
    %cst_77 = arith.constant dense<0.000000e+00> : vector<2x32xf32>
    %174 = tpu.matmul %155, %8, %cst_77 {dimension_numbers = #tpu.dot_dimension_numbers<[1], [0], [0], [1], [0, 0, 1, 1], [], []>} : vector<2x32xbf16>, vector<32x32xbf16>, vector<2x32xf32> -> vector<2x32xf32>
    %175 = arith.addf %173, %174 : vector<2x32xf32>
    %cst_78 = arith.constant dense<0.000000e+00> : vector<2x32xf32>
    %176 = tpu.matmul %156, %14, %cst_78 {dimension_numbers = #tpu.dot_dimension_numbers<[1], [0], [0], [1], [0, 0, 1, 1], [], []>} : vector<2x32xbf16>, vector<32x32xbf16>, vector<2x32xf32> -> vector<2x32xf32>
    %177 = arith.addf %175, %176 : vector<2x32xf32>
    %178 = arith.negf %163 : vector<2x32xf32>
    %179 = math.exp %178 : vector<2x32xf32>
    %cst_79 = arith.constant 1.000000e+00 : f32
    %180 = vector.broadcast %cst_79 : f32 to vector<2x32xf32>
    %181 = arith.addf %180, %179 : vector<2x32xf32>
    %182 = arith.divf %180, %181 : vector<2x32xf32>
    %183 = math.tanh %170 : vector<2x32xf32>
    %184 = arith.negf %177 : vector<2x32xf32>
    %185 = math.exp %184 : vector<2x32xf32>
    %cst_80 = arith.constant 1.000000e+00 : f32
    %186 = vector.broadcast %cst_80 : f32 to vector<2x32xf32>
    %187 = arith.addf %186, %185 : vector<2x32xf32>
    %188 = arith.divf %186, %187 : vector<2x32xf32>
    %189 = arith.mulf %182, %183 : vector<2x32xf32>
    %190 = math.tanh %189 : vector<2x32xf32>
    %191 = arith.mulf %188, %190 : vector<2x32xf32>
    %192 = arith.index_cast %c2_i32 : i32 to index
    %c0_81 = arith.constant 0 : index
    %c0_82 = arith.constant 0 : index
    %193 = vector.load %arg9[%192, %c0_81, %c0_82] : memref<7x2x32xf32, #tpu.memory_space<vmem>>, vector<1x2x32xf32>
    %194 = vector.shape_cast %193 : vector<1x2x32xf32> to vector<2x32xf32>
    %195 = vector.shape_cast %191 : vector<2x32xf32> to vector<1x2x32xf32>
    tpu.vector_store %arg9[%192, %c0_81, %c0_82], %195 {strides = array<i32>} : memref<7x2x32xf32, #tpu.memory_space<vmem>>, vector<1x2x32xf32>,
    %c3_i32 = arith.constant 3 : i32
    %196 = vector.broadcast %2 : vector<1x32xf32> to vector<2x32xf32>
    %197 = arith.mulf %191, %196 : vector<2x32xf32>
    %cst_83 = arith.constant dense<0.000000e+00> : vector<2xf32>
    %198 = vector.multi_reduction <add>, %197, %cst_83 [1] : vector<2x32xf32> to vector<2xf32>
    %199 = vector.shape_cast %198 : vector<2xf32> to vector<2x1xf32>
    %200 = vector.broadcast %199 : vector<2x1xf32> to vector<2x8xf32>
    %201 = arith.addf %1, %200 : vector<2x8xf32>
    %cst_84 = arith.constant dense<0xFF800000> : vector<2xf32>
    %202 = vector.multi_reduction <maximumf>, %201, %cst_84 [1] : vector<2x8xf32> to vector<2xf32>
    %203 = vector.shape_cast %202 : vector<2xf32> to vector<2x1xf32>
    %204 = vector.broadcast %203 : vector<2x1xf32> to vector<2x8xf32>
    %205 = arith.subf %201, %204 : vector<2x8xf32>
    %206 = math.exp %205 : vector<2x8xf32>
    %cst_85 = arith.constant dense<0.000000e+00> : vector<2xf32>
    %207 = vector.multi_reduction <add>, %206, %cst_85 [1] : vector<2x8xf32> to vector<2xf32>
    %208 = vector.shape_cast %207 : vector<2xf32> to vector<2x1xf32>
    %209 = vector.broadcast %208 : vector<2x1xf32> to vector<2x8xf32>
    %210 = arith.divf %206, %209 : vector<2x8xf32>
    %211 = vector.shape_cast %210 : vector<2x8xf32> to vector<2x1x8xf32>
    %212 = arith.truncf %211 : vector<2x1x8xf32> to vector<2x1x8xbf16>
    "tpu.trace_start"() <{level = 10 : i32, message = "bqs,bsh->bqh"}> : () -> ()
    %cst_86 = arith.constant dense<0.000000e+00> : vector<2x1x32xf32>
    %213 = tpu.matmul %212, %0, %cst_86 {dimension_numbers = #tpu.dot_dimension_numbers<[2], [1], [1], [2], [0, 0, 0, 1, 1, 2], [0], [0]>} : vector<2x1x8xbf16>, vector<2x8x32xbf16>, vector<2x1x32xf32> -> vector<2x1x32xf32>
    "tpu.trace_stop"() : () -> ()
    %214 = vector.shape_cast %213 : vector<2x1x32xf32> to vector<2x32xf32>
    %215 = arith.truncf %214 : vector<2x32xf32> to vector<2x32xbf16>
    %216 = arith.truncf %191 : vector<2x32xf32> to vector<2x32xbf16>
    %217 = arith.index_cast %c3_i32 : i32 to index
    %c0_87 = arith.constant 0 : index
    %c0_88 = arith.constant 0 : index
    %218 = vector.load %arg4[%217, %c0_87, %c0_88] : memref<7x2x32xf32, #tpu.memory_space<vmem>>, vector<1x2x32xf32>
    %219 = vector.shape_cast %218 : vector<1x2x32xf32> to vector<2x32xf32>
    %cst_89 = arith.constant dense<0.000000e+00> : vector<2x32xf32>
    %220 = tpu.matmul %215, %4, %cst_89 {dimension_numbers = #tpu.dot_dimension_numbers<[1], [0], [0], [1], [0, 0, 1, 1], [], []>} : vector<2x32xbf16>, vector<32x32xbf16>, vector<2x32xf32> -> vector<2x32xf32>
    %221 = arith.addf %219, %220 : vector<2x32xf32>
    %cst_90 = arith.constant dense<0.000000e+00> : vector<2x32xf32>
    %222 = tpu.matmul %216, %10, %cst_90 {dimension_numbers = #tpu.dot_dimension_numbers<[1], [0], [0], [1], [0, 0, 1, 1], [], []>} : vector<2x32xbf16>, vector<32x32xbf16>, vector<2x32xf32> -> vector<2x32xf32>
    %223 = arith.addf %221, %222 : vector<2x32xf32>
    %224 = arith.index_cast %c3_i32 : i32 to index
    %c0_91 = arith.constant 0 : index
    %c0_92 = arith.constant 0 : index
    %225 = vector.load %arg5[%224, %c0_91, %c0_92] : memref<7x2x32xf32, #tpu.memory_space<vmem>>, vector<1x2x32xf32>
    %226 = vector.shape_cast %225 : vector<1x2x32xf32> to vector<2x32xf32>
    %cst_93 = arith.constant dense<0.000000e+00> : vector<2x32xf32>
    %227 = tpu.matmul %215, %6, %cst_93 {dimension_numbers = #tpu.dot_dimension_numbers<[1], [0], [0], [1], [0, 0, 1, 1], [], []>} : vector<2x32xbf16>, vector<32x32xbf16>, vector<2x32xf32> -> vector<2x32xf32>
    %228 = arith.addf %226, %227 : vector<2x32xf32>
    %cst_94 = arith.constant dense<0.000000e+00> : vector<2x32xf32>
    %229 = tpu.matmul %216, %12, %cst_94 {dimension_numbers = #tpu.dot_dimension_numbers<[1], [0], [0], [1], [0, 0, 1, 1], [], []>} : vector<2x32xbf16>, vector<32x32xbf16>, vector<2x32xf32> -> vector<2x32xf32>
    %230 = arith.addf %228, %229 : vector<2x32xf32>
    %231 = arith.index_cast %c3_i32 : i32 to index
    %c0_95 = arith.constant 0 : index
    %c0_96 = arith.constant 0 : index
    %232 = vector.load %arg6[%231, %c0_95, %c0_96] : memref<7x2x32xf32, #tpu.memory_space<vmem>>, vector<1x2x32xf32>
    %233 = vector.shape_cast %232 : vector<1x2x32xf32> to vector<2x32xf32>
    %cst_97 = arith.constant dense<0.000000e+00> : vector<2x32xf32>
    %234 = tpu.matmul %215, %8, %cst_97 {dimension_numbers = #tpu.dot_dimension_numbers<[1], [0], [0], [1], [0, 0, 1, 1], [], []>} : vector<2x32xbf16>, vector<32x32xbf16>, vector<2x32xf32> -> vector<2x32xf32>
    %235 = arith.addf %233, %234 : vector<2x32xf32>
    %cst_98 = arith.constant dense<0.000000e+00> : vector<2x32xf32>
    %236 = tpu.matmul %216, %14, %cst_98 {dimension_numbers = #tpu.dot_dimension_numbers<[1], [0], [0], [1], [0, 0, 1, 1], [], []>} : vector<2x32xbf16>, vector<32x32xbf16>, vector<2x32xf32> -> vector<2x32xf32>
    %237 = arith.addf %235, %236 : vector<2x32xf32>
    %238 = arith.negf %223 : vector<2x32xf32>
    %239 = math.exp %238 : vector<2x32xf32>
    %cst_99 = arith.constant 1.000000e+00 : f32
    %240 = vector.broadcast %cst_99 : f32 to vector<2x32xf32>
    %241 = arith.addf %240, %239 : vector<2x32xf32>
    %242 = arith.divf %240, %241 : vector<2x32xf32>
    %243 = math.tanh %230 : vector<2x32xf32>
    %244 = arith.negf %237 : vector<2x32xf32>
    %245 = math.exp %244 : vector<2x32xf32>
    %cst_100 = arith.constant 1.000000e+00 : f32
    %246 = vector.broadcast %cst_100 : f32 to vector<2x32xf32>
    %247 = arith.addf %246, %245 : vector<2x32xf32>
    %248 = arith.divf %246, %247 : vector<2x32xf32>
    %249 = arith.mulf %242, %243 : vector<2x32xf32>
    %250 = math.tanh %249 : vector<2x32xf32>
    %251 = arith.mulf %248, %250 : vector<2x32xf32>
    %252 = arith.index_cast %c3_i32 : i32 to index
    %c0_101 = arith.constant 0 : index
    %c0_102 = arith.constant 0 : index
    %253 = vector.load %arg9[%252, %c0_101, %c0_102] : memref<7x2x32xf32, #tpu.memory_space<vmem>>, vector<1x2x32xf32>
    %254 = vector.shape_cast %253 : vector<1x2x32xf32> to vector<2x32xf32>
    %255 = vector.shape_cast %251 : vector<2x32xf32> to vector<1x2x32xf32>
    tpu.vector_store %arg9[%252, %c0_101, %c0_102], %255 {strides = array<i32>} : memref<7x2x32xf32, #tpu.memory_space<vmem>>, vector<1x2x32xf32>,
    %c4_i32 = arith.constant 4 : i32
    %256 = vector.broadcast %2 : vector<1x32xf32> to vector<2x32xf32>
    %257 = arith.mulf %251, %256 : vector<2x32xf32>
    %cst_103 = arith.constant dense<0.000000e+00> : vector<2xf32>
    %258 = vector.multi_reduction <add>, %257, %cst_103 [1] : vector<2x32xf32> to vector<2xf32>
    %259 = vector.shape_cast %258 : vector<2xf32> to vector<2x1xf32>
    %260 = vector.broadcast %259 : vector<2x1xf32> to vector<2x8xf32>
    %261 = arith.addf %1, %260 : vector<2x8xf32>
    %cst_104 = arith.constant dense<0xFF800000> : vector<2xf32>
    %262 = vector.multi_reduction <maximumf>, %261, %cst_104 [1] : vector<2x8xf32> to vector<2xf32>
    %263 = vector.shape_cast %262 : vector<2xf32> to vector<2x1xf32>
    %264 = vector.broadcast %263 : vector<2x1xf32> to vector<2x8xf32>
    %265 = arith.subf %261, %264 : vector<2x8xf32>
    %266 = math.exp %265 : vector<2x8xf32>
    %cst_105 = arith.constant dense<0.000000e+00> : vector<2xf32>
    %267 = vector.multi_reduction <add>, %266, %cst_105 [1] : vector<2x8xf32> to vector<2xf32>
    %268 = vector.shape_cast %267 : vector<2xf32> to vector<2x1xf32>
    %269 = vector.broadcast %268 : vector<2x1xf32> to vector<2x8xf32>
    %270 = arith.divf %266, %269 : vector<2x8xf32>
    %271 = vector.shape_cast %270 : vector<2x8xf32> to vector<2x1x8xf32>
    %272 = arith.truncf %271 : vector<2x1x8xf32> to vector<2x1x8xbf16>
    "tpu.trace_start"() <{level = 10 : i32, message = "bqs,bsh->bqh"}> : () -> ()
    %cst_106 = arith.constant dense<0.000000e+00> : vector<2x1x32xf32>
    %273 = tpu.matmul %272, %0, %cst_106 {dimension_numbers = #tpu.dot_dimension_numbers<[2], [1], [1], [2], [0, 0, 0, 1, 1, 2], [0], [0]>} : vector<2x1x8xbf16>, vector<2x8x32xbf16>, vector<2x1x32xf32> -> vector<2x1x32xf32>
    "tpu.trace_stop"() : () -> ()
    %274 = vector.shape_cast %273 : vector<2x1x32xf32> to vector<2x32xf32>
    %275 = arith.truncf %274 : vector<2x32xf32> to vector<2x32xbf16>
    %276 = arith.truncf %251 : vector<2x32xf32> to vector<2x32xbf16>
    %277 = arith.index_cast %c4_i32 : i32 to index
    %c0_107 = arith.constant 0 : index
    %c0_108 = arith.constant 0 : index
    %278 = vector.load %arg4[%277, %c0_107, %c0_108] : memref<7x2x32xf32, #tpu.memory_space<vmem>>, vector<1x2x32xf32>
    %279 = vector.shape_cast %278 : vector<1x2x32xf32> to vector<2x32xf32>
    %cst_109 = arith.constant dense<0.000000e+00> : vector<2x32xf32>
    %280 = tpu.matmul %275, %4, %cst_109 {dimension_numbers = #tpu.dot_dimension_numbers<[1], [0], [0], [1], [0, 0, 1, 1], [], []>} : vector<2x32xbf16>, vector<32x32xbf16>, vector<2x32xf32> -> vector<2x32xf32>
    %281 = arith.addf %279, %280 : vector<2x32xf32>
    %cst_110 = arith.constant dense<0.000000e+00> : vector<2x32xf32>
    %282 = tpu.matmul %276, %10, %cst_110 {dimension_numbers = #tpu.dot_dimension_numbers<[1], [0], [0], [1], [0, 0, 1, 1], [], []>} : vector<2x32xbf16>, vector<32x32xbf16>, vector<2x32xf32> -> vector<2x32xf32>
    %283 = arith.addf %281, %282 : vector<2x32xf32>
    %284 = arith.index_cast %c4_i32 : i32 to index
    %c0_111 = arith.constant 0 : index
    %c0_112 = arith.constant 0 : index
    %285 = vector.load %arg5[%284, %c0_111, %c0_112] : memref<7x2x32xf32, #tpu.memory_space<vmem>>, vector<1x2x32xf32>
    %286 = vector.shape_cast %285 : vector<1x2x32xf32> to vector<2x32xf32>
    %cst_113 = arith.constant dense<0.000000e+00> : vector<2x32xf32>
    %287 = tpu.matmul %275, %6, %cst_113 {dimension_numbers = #tpu.dot_dimension_numbers<[1], [0], [0], [1], [0, 0, 1, 1], [], []>} : vector<2x32xbf16>, vector<32x32xbf16>, vector<2x32xf32> -> vector<2x32xf32>
    %288 = arith.addf %286, %287 : vector<2x32xf32>
    %cst_114 = arith.constant dense<0.000000e+00> : vector<2x32xf32>
    %289 = tpu.matmul %276, %12, %cst_114 {dimension_numbers = #tpu.dot_dimension_numbers<[1], [0], [0], [1], [0, 0, 1, 1], [], []>} : vector<2x32xbf16>, vector<32x32xbf16>, vector<2x32xf32> -> vector<2x32xf32>
    %290 = arith.addf %288, %289 : vector<2x32xf32>
    %291 = arith.index_cast %c4_i32 : i32 to index
    %c0_115 = arith.constant 0 : index
    %c0_116 = arith.constant 0 : index
    %292 = vector.load %arg6[%291, %c0_115, %c0_116] : memref<7x2x32xf32, #tpu.memory_space<vmem>>, vector<1x2x32xf32>
    %293 = vector.shape_cast %292 : vector<1x2x32xf32> to vector<2x32xf32>
    %cst_117 = arith.constant dense<0.000000e+00> : vector<2x32xf32>
    %294 = tpu.matmul %275, %8, %cst_117 {dimension_numbers = #tpu.dot_dimension_numbers<[1], [0], [0], [1], [0, 0, 1, 1], [], []>} : vector<2x32xbf16>, vector<32x32xbf16>, vector<2x32xf32> -> vector<2x32xf32>
    %295 = arith.addf %293, %294 : vector<2x32xf32>
    %cst_118 = arith.constant dense<0.000000e+00> : vector<2x32xf32>
    %296 = tpu.matmul %276, %14, %cst_118 {dimension_numbers = #tpu.dot_dimension_numbers<[1], [0], [0], [1], [0, 0, 1, 1], [], []>} : vector<2x32xbf16>, vector<32x32xbf16>, vector<2x32xf32> -> vector<2x32xf32>
    %297 = arith.addf %295, %296 : vector<2x32xf32>
    %298 = arith.negf %283 : vector<2x32xf32>
    %299 = math.exp %298 : vector<2x32xf32>
    %cst_119 = arith.constant 1.000000e+00 : f32
    %300 = vector.broadcast %cst_119 : f32 to vector<2x32xf32>
    %301 = arith.addf %300, %299 : vector<2x32xf32>
    %302 = arith.divf %300, %301 : vector<2x32xf32>
    %303 = math.tanh %290 : vector<2x32xf32>
    %304 = arith.negf %297 : vector<2x32xf32>
    %305 = math.exp %304 : vector<2x32xf32>
    %cst_120 = arith.constant 1.000000e+00 : f32
    %306 = vector.broadcast %cst_120 : f32 to vector<2x32xf32>
    %307 = arith.addf %306, %305 : vector<2x32xf32>
    %308 = arith.divf %306, %307 : vector<2x32xf32>
    %309 = arith.mulf %302, %303 : vector<2x32xf32>
    %310 = math.tanh %309 : vector<2x32xf32>
    %311 = arith.mulf %308, %310 : vector<2x32xf32>
    %312 = arith.index_cast %c4_i32 : i32 to index
    %c0_121 = arith.constant 0 : index
    %c0_122 = arith.constant 0 : index
    %313 = vector.load %arg9[%312, %c0_121, %c0_122] : memref<7x2x32xf32, #tpu.memory_space<vmem>>, vector<1x2x32xf32>
    %314 = vector.shape_cast %313 : vector<1x2x32xf32> to vector<2x32xf32>
    %315 = vector.shape_cast %311 : vector<2x32xf32> to vector<1x2x32xf32>
    tpu.vector_store %arg9[%312, %c0_121, %c0_122], %315 {strides = array<i32>} : memref<7x2x32xf32, #tpu.memory_space<vmem>>, vector<1x2x32xf32>,
    %c5_i32 = arith.constant 5 : i32
    %316 = vector.broadcast %2 : vector<1x32xf32> to vector<2x32xf32>
    %317 = arith.mulf %311, %316 : vector<2x32xf32>
    %cst_123 = arith.constant dense<0.000000e+00> : vector<2xf32>
    %318 = vector.multi_reduction <add>, %317, %cst_123 [1] : vector<2x32xf32> to vector<2xf32>
    %319 = vector.shape_cast %318 : vector<2xf32> to vector<2x1xf32>
    %320 = vector.broadcast %319 : vector<2x1xf32> to vector<2x8xf32>
    %321 = arith.addf %1, %320 : vector<2x8xf32>
    %cst_124 = arith.constant dense<0xFF800000> : vector<2xf32>
    %322 = vector.multi_reduction <maximumf>, %321, %cst_124 [1] : vector<2x8xf32> to vector<2xf32>
    %323 = vector.shape_cast %322 : vector<2xf32> to vector<2x1xf32>
    %324 = vector.broadcast %323 : vector<2x1xf32> to vector<2x8xf32>
    %325 = arith.subf %321, %324 : vector<2x8xf32>
    %326 = math.exp %325 : vector<2x8xf32>
    %cst_125 = arith.constant dense<0.000000e+00> : vector<2xf32>
    %327 = vector.multi_reduction <add>, %326, %cst_125 [1] : vector<2x8xf32> to vector<2xf32>
    %328 = vector.shape_cast %327 : vector<2xf32> to vector<2x1xf32>
    %329 = vector.broadcast %328 : vector<2x1xf32> to vector<2x8xf32>
    %330 = arith.divf %326, %329 : vector<2x8xf32>
    %331 = vector.shape_cast %330 : vector<2x8xf32> to vector<2x1x8xf32>
    %332 = arith.truncf %331 : vector<2x1x8xf32> to vector<2x1x8xbf16>
    "tpu.trace_start"() <{level = 10 : i32, message = "bqs,bsh->bqh"}> : () -> ()
    %cst_126 = arith.constant dense<0.000000e+00> : vector<2x1x32xf32>
    %333 = tpu.matmul %332, %0, %cst_126 {dimension_numbers = #tpu.dot_dimension_numbers<[2], [1], [1], [2], [0, 0, 0, 1, 1, 2], [0], [0]>} : vector<2x1x8xbf16>, vector<2x8x32xbf16>, vector<2x1x32xf32> -> vector<2x1x32xf32>
    "tpu.trace_stop"() : () -> ()
    %334 = vector.shape_cast %333 : vector<2x1x32xf32> to vector<2x32xf32>
    %335 = arith.truncf %334 : vector<2x32xf32> to vector<2x32xbf16>
    %336 = arith.truncf %311 : vector<2x32xf32> to vector<2x32xbf16>
    %337 = arith.index_cast %c5_i32 : i32 to index
    %c0_127 = arith.constant 0 : index
    %c0_128 = arith.constant 0 : index
    %338 = vector.load %arg4[%337, %c0_127, %c0_128] : memref<7x2x32xf32, #tpu.memory_space<vmem>>, vector<1x2x32xf32>
    %339 = vector.shape_cast %338 : vector<1x2x32xf32> to vector<2x32xf32>
    %cst_129 = arith.constant dense<0.000000e+00> : vector<2x32xf32>
    %340 = tpu.matmul %335, %4, %cst_129 {dimension_numbers = #tpu.dot_dimension_numbers<[1], [0], [0], [1], [0, 0, 1, 1], [], []>} : vector<2x32xbf16>, vector<32x32xbf16>, vector<2x32xf32> -> vector<2x32xf32>
    %341 = arith.addf %339, %340 : vector<2x32xf32>
    %cst_130 = arith.constant dense<0.000000e+00> : vector<2x32xf32>
    %342 = tpu.matmul %336, %10, %cst_130 {dimension_numbers = #tpu.dot_dimension_numbers<[1], [0], [0], [1], [0, 0, 1, 1], [], []>} : vector<2x32xbf16>, vector<32x32xbf16>, vector<2x32xf32> -> vector<2x32xf32>
    %343 = arith.addf %341, %342 : vector<2x32xf32>
    %344 = arith.index_cast %c5_i32 : i32 to index
    %c0_131 = arith.constant 0 : index
    %c0_132 = arith.constant 0 : index
    %345 = vector.load %arg5[%344, %c0_131, %c0_132] : memref<7x2x32xf32, #tpu.memory_space<vmem>>, vector<1x2x32xf32>
    %346 = vector.shape_cast %345 : vector<1x2x32xf32> to vector<2x32xf32>
    %cst_133 = arith.constant dense<0.000000e+00> : vector<2x32xf32>
    %347 = tpu.matmul %335, %6, %cst_133 {dimension_numbers = #tpu.dot_dimension_numbers<[1], [0], [0], [1], [0, 0, 1, 1], [], []>} : vector<2x32xbf16>, vector<32x32xbf16>, vector<2x32xf32> -> vector<2x32xf32>
    %348 = arith.addf %346, %347 : vector<2x32xf32>
    %cst_134 = arith.constant dense<0.000000e+00> : vector<2x32xf32>
    %349 = tpu.matmul %336, %12, %cst_134 {dimension_numbers = #tpu.dot_dimension_numbers<[1], [0], [0], [1], [0, 0, 1, 1], [], []>} : vector<2x32xbf16>, vector<32x32xbf16>, vector<2x32xf32> -> vector<2x32xf32>
    %350 = arith.addf %348, %349 : vector<2x32xf32>
    %351 = arith.index_cast %c5_i32 : i32 to index
    %c0_135 = arith.constant 0 : index
    %c0_136 = arith.constant 0 : index
    %352 = vector.load %arg6[%351, %c0_135, %c0_136] : memref<7x2x32xf32, #tpu.memory_space<vmem>>, vector<1x2x32xf32>
    %353 = vector.shape_cast %352 : vector<1x2x32xf32> to vector<2x32xf32>
    %cst_137 = arith.constant dense<0.000000e+00> : vector<2x32xf32>
    %354 = tpu.matmul %335, %8, %cst_137 {dimension_numbers = #tpu.dot_dimension_numbers<[1], [0], [0], [1], [0, 0, 1, 1], [], []>} : vector<2x32xbf16>, vector<32x32xbf16>, vector<2x32xf32> -> vector<2x32xf32>
    %355 = arith.addf %353, %354 : vector<2x32xf32>
    %cst_138 = arith.constant dense<0.000000e+00> : vector<2x32xf32>
    %356 = tpu.matmul %336, %14, %cst_138 {dimension_numbers = #tpu.dot_dimension_numbers<[1], [0], [0], [1], [0, 0, 1, 1], [], []>} : vector<2x32xbf16>, vector<32x32xbf16>, vector<2x32xf32> -> vector<2x32xf32>
    %357 = arith.addf %355, %356 : vector<2x32xf32>
    %358 = arith.negf %343 : vector<2x32xf32>
    %359 = math.exp %358 : vector<2x32xf32>
    %cst_139 = arith.constant 1.000000e+00 : f32
    %360 = vector.broadcast %cst_139 : f32 to vector<2x32xf32>
    %361 = arith.addf %360, %359 : vector<2x32xf32>
    %362 = arith.divf %360, %361 : vector<2x32xf32>
    %363 = math.tanh %350 : vector<2x32xf32>
    %364 = arith.negf %357 : vector<2x32xf32>
    %365 = math.exp %364 : vector<2x32xf32>
    %cst_140 = arith.constant 1.000000e+00 : f32
    %366 = vector.broadcast %cst_140 : f32 to vector<2x32xf32>
    %367 = arith.addf %366, %365 : vector<2x32xf32>
    %368 = arith.divf %366, %367 : vector<2x32xf32>
    %369 = arith.mulf %362, %363 : vector<2x32xf32>
    %370 = math.tanh %369 : vector<2x32xf32>
    %371 = arith.mulf %368, %370 : vector<2x32xf32>
    %372 = arith.index_cast %c5_i32 : i32 to index
    %c0_141 = arith.constant 0 : index
    %c0_142 = arith.constant 0 : index
    %373 = vector.load %arg9[%372, %c0_141, %c0_142] : memref<7x2x32xf32, #tpu.memory_space<vmem>>, vector<1x2x32xf32>
    %374 = vector.shape_cast %373 : vector<1x2x32xf32> to vector<2x32xf32>
    %375 = vector.shape_cast %371 : vector<2x32xf32> to vector<1x2x32xf32>
    tpu.vector_store %arg9[%372, %c0_141, %c0_142], %375 {strides = array<i32>} : memref<7x2x32xf32, #tpu.memory_space<vmem>>, vector<1x2x32xf32>,
    %c6_i32 = arith.constant 6 : i32
    %376 = vector.broadcast %2 : vector<1x32xf32> to vector<2x32xf32>
    %377 = arith.mulf %371, %376 : vector<2x32xf32>
    %cst_143 = arith.constant dense<0.000000e+00> : vector<2xf32>
    %378 = vector.multi_reduction <add>, %377, %cst_143 [1] : vector<2x32xf32> to vector<2xf32>
    %379 = vector.shape_cast %378 : vector<2xf32> to vector<2x1xf32>
    %380 = vector.broadcast %379 : vector<2x1xf32> to vector<2x8xf32>
    %381 = arith.addf %1, %380 : vector<2x8xf32>
    %cst_144 = arith.constant dense<0xFF800000> : vector<2xf32>
    %382 = vector.multi_reduction <maximumf>, %381, %cst_144 [1] : vector<2x8xf32> to vector<2xf32>
    %383 = vector.shape_cast %382 : vector<2xf32> to vector<2x1xf32>
    %384 = vector.broadcast %383 : vector<2x1xf32> to vector<2x8xf32>
    %385 = arith.subf %381, %384 : vector<2x8xf32>
    %386 = math.exp %385 : vector<2x8xf32>
    %cst_145 = arith.constant dense<0.000000e+00> : vector<2xf32>
    %387 = vector.multi_reduction <add>, %386, %cst_145 [1] : vector<2x8xf32> to vector<2xf32>
    %388 = vector.shape_cast %387 : vector<2xf32> to vector<2x1xf32>
    %389 = vector.broadcast %388 : vector<2x1xf32> to vector<2x8xf32>
    %390 = arith.divf %386, %389 : vector<2x8xf32>
    %391 = vector.shape_cast %390 : vector<2x8xf32> to vector<2x1x8xf32>
    %392 = arith.truncf %391 : vector<2x1x8xf32> to vector<2x1x8xbf16>
    "tpu.trace_start"() <{level = 10 : i32, message = "bqs,bsh->bqh"}> : () -> ()
    %cst_146 = arith.constant dense<0.000000e+00> : vector<2x1x32xf32>
    %393 = tpu.matmul %392, %0, %cst_146 {dimension_numbers = #tpu.dot_dimension_numbers<[2], [1], [1], [2], [0, 0, 0, 1, 1, 2], [0], [0]>} : vector<2x1x8xbf16>, vector<2x8x32xbf16>, vector<2x1x32xf32> -> vector<2x1x32xf32>
    "tpu.trace_stop"() : () -> ()
    %394 = vector.shape_cast %393 : vector<2x1x32xf32> to vector<2x32xf32>
    %395 = arith.truncf %394 : vector<2x32xf32> to vector<2x32xbf16>
    %396 = arith.truncf %371 : vector<2x32xf32> to vector<2x32xbf16>
    %397 = arith.index_cast %c6_i32 : i32 to index
    %c0_147 = arith.constant 0 : index
    %c0_148 = arith.constant 0 : index
    %398 = vector.load %arg4[%397, %c0_147, %c0_148] : memref<7x2x32xf32, #tpu.memory_space<vmem>>, vector<1x2x32xf32>
    %399 = vector.shape_cast %398 : vector<1x2x32xf32> to vector<2x32xf32>
    %cst_149 = arith.constant dense<0.000000e+00> : vector<2x32xf32>
    %400 = tpu.matmul %395, %4, %cst_149 {dimension_numbers = #tpu.dot_dimension_numbers<[1], [0], [0], [1], [0, 0, 1, 1], [], []>} : vector<2x32xbf16>, vector<32x32xbf16>, vector<2x32xf32> -> vector<2x32xf32>
    %401 = arith.addf %399, %400 : vector<2x32xf32>
    %cst_150 = arith.constant dense<0.000000e+00> : vector<2x32xf32>
    %402 = tpu.matmul %396, %10, %cst_150 {dimension_numbers = #tpu.dot_dimension_numbers<[1], [0], [0], [1], [0, 0, 1, 1], [], []>} : vector<2x32xbf16>, vector<32x32xbf16>, vector<2x32xf32> -> vector<2x32xf32>
    %403 = arith.addf %401, %402 : vector<2x32xf32>
    %404 = arith.index_cast %c6_i32 : i32 to index
    %c0_151 = arith.constant 0 : index
    %c0_152 = arith.constant 0 : index
    %405 = vector.load %arg5[%404, %c0_151, %c0_152] : memref<7x2x32xf32, #tpu.memory_space<vmem>>, vector<1x2x32xf32>
    %406 = vector.shape_cast %405 : vector<1x2x32xf32> to vector<2x32xf32>
    %cst_153 = arith.constant dense<0.000000e+00> : vector<2x32xf32>
    %407 = tpu.matmul %395, %6, %cst_153 {dimension_numbers = #tpu.dot_dimension_numbers<[1], [0], [0], [1], [0, 0, 1, 1], [], []>} : vector<2x32xbf16>, vector<32x32xbf16>, vector<2x32xf32> -> vector<2x32xf32>
    %408 = arith.addf %406, %407 : vector<2x32xf32>
    %cst_154 = arith.constant dense<0.000000e+00> : vector<2x32xf32>
    %409 = tpu.matmul %396, %12, %cst_154 {dimension_numbers = #tpu.dot_dimension_numbers<[1], [0], [0], [1], [0, 0, 1, 1], [], []>} : vector<2x32xbf16>, vector<32x32xbf16>, vector<2x32xf32> -> vector<2x32xf32>
    %410 = arith.addf %408, %409 : vector<2x32xf32>
    %411 = arith.index_cast %c6_i32 : i32 to index
    %c0_155 = arith.constant 0 : index
    %c0_156 = arith.constant 0 : index
    %412 = vector.load %arg6[%411, %c0_155, %c0_156] : memref<7x2x32xf32, #tpu.memory_space<vmem>>, vector<1x2x32xf32>
    %413 = vector.shape_cast %412 : vector<1x2x32xf32> to vector<2x32xf32>
    %cst_157 = arith.constant dense<0.000000e+00> : vector<2x32xf32>
    %414 = tpu.matmul %395, %8, %cst_157 {dimension_numbers = #tpu.dot_dimension_numbers<[1], [0], [0], [1], [0, 0, 1, 1], [], []>} : vector<2x32xbf16>, vector<32x32xbf16>, vector<2x32xf32> -> vector<2x32xf32>
    %415 = arith.addf %413, %414 : vector<2x32xf32>
    %cst_158 = arith.constant dense<0.000000e+00> : vector<2x32xf32>
    %416 = tpu.matmul %396, %14, %cst_158 {dimension_numbers = #tpu.dot_dimension_numbers<[1], [0], [0], [1], [0, 0, 1, 1], [], []>} : vector<2x32xbf16>, vector<32x32xbf16>, vector<2x32xf32> -> vector<2x32xf32>
    %417 = arith.addf %415, %416 : vector<2x32xf32>
    %418 = arith.negf %403 : vector<2x32xf32>
    %419 = math.exp %418 : vector<2x32xf32>
    %cst_159 = arith.constant 1.000000e+00 : f32
    %420 = vector.broadcast %cst_159 : f32 to vector<2x32xf32>
    %421 = arith.addf %420, %419 : vector<2x32xf32>
    %422 = arith.divf %420, %421 : vector<2x32xf32>
    %423 = math.tanh %410 : vector<2x32xf32>
    %424 = arith.negf %417 : vector<2x32xf32>
    %425 = math.exp %424 : vector<2x32xf32>
    %cst_160 = arith.constant 1.000000e+00 : f32
    %426 = vector.broadcast %cst_160 : f32 to vector<2x32xf32>
    %427 = arith.addf %426, %425 : vector<2x32xf32>
    %428 = arith.divf %426, %427 : vector<2x32xf32>
    %429 = arith.mulf %422, %423 : vector<2x32xf32>
    %430 = math.tanh %429 : vector<2x32xf32>
    %431 = arith.mulf %428, %430 : vector<2x32xf32>
    %432 = arith.index_cast %c6_i32 : i32 to index
    %c0_161 = arith.constant 0 : index
    %c0_162 = arith.constant 0 : index
    %433 = vector.load %arg9[%432, %c0_161, %c0_162] : memref<7x2x32xf32, #tpu.memory_space<vmem>>, vector<1x2x32xf32>
    %434 = vector.shape_cast %433 : vector<1x2x32xf32> to vector<2x32xf32>
    %435 = vector.shape_cast %431 : vector<2x32xf32> to vector<1x2x32xf32>
    tpu.vector_store %arg9[%432, %c0_161, %c0_162], %435 {strides = array<i32>} : memref<7x2x32xf32, #tpu.memory_space<vmem>>, vector<1x2x32xf32>,
    %c7_i32 = arith.constant 7 : i32
    return
  }
}

</mosaic_0001>

<bundles_post_ra>
// kernel: rnn_decoder_forward.1
= control target key start
LH: loop header
LB: loop body
LE: loop exit
PB: predicated region body
PF: predicated region fallthrough
CT: control target
= control target key end

     0   :  { %vm70_vm0 = vcmask 254976   ;;  %vm75_vm1 = vcmask 58368   ;;  %vm109_vm2 = vcmask 1043456   ;;  %vm105_vm7 = vcmask 64512   ;;  %s2485_s2 = inlined_call_operand.vmem [shape: f32[2,32], index: 2, kind: input, shape index: {}]   ;;  %s2486_s3 = inlined_call_operand.vmem [shape: f32[1,32], index: 3, kind: input, shape index: {}]   ;;  %s2487_s1 = inlined_call_operand.vmem [shape: f32[2,8], index: 1, kind: input, shape index: {}]   ;;  %s2488_s0 = inlined_call_operand.vmem [shape: bf16[2,8,32], index: 0, kind: input, shape index: {}]   ;;  %s2489_s8 = inlined_call_operand.vmem [shape: bf16[3,32,32], index: 8, kind: input, shape index: {}]   ;;  %s2490_s7 = inlined_call_operand.vmem [shape: bf16[3,32,32], index: 7, kind: input, shape index: {}]   ;;  %s2491_s4 = inlined_call_operand.vmem [shape: f32[7,2,32], index: 4, kind: input, shape index: {}]   ;;  %s2492_s6 = inlined_call_operand.vmem [shape: f32[7,2,32], index: 6, kind: input, shape index: {}]   ;;  %s2493_s5 = inlined_call_operand.vmem [shape: f32[7,2,32], index: 5, kind: input, shape index: {}]   ;;  %s2494_s9 = inlined_call_operand.vmem [shape: f32[7,2,32], index: 9, kind: output, shape index: {}]  }
   0x1   :  { %v65_v0 = vld [vmem:[%s2485_s2] sm:$0x3]  ;;  %v34_v14 = vld [vmem:[%s2488_s0 + $0x4] sm:$0xf]  ;;  %v2045_v17 = vld [vmem:[%s2489_s8 + $0x8] sm:$0xff]  ;;  %vm169_vm8 = vcmask 261120  }
   0x2   :  { %v2018_v1 = vld [vmem:[%s2486_s3] ss:$0 sm:$0xff]  ;;  %v2038_v16 = vsel %vm109_vm2, %v34_v14, 0  ;;  %208 = vmatpush.bf16.msra.mxu3 %v2045_v17  ;;  %v147_v34 = vpack.c.bf16 %v65_v0, %v65_v0  ;;  %v2059_v35 = vld [vmem:[%s2490_s7 + $0x8] sm:$0xff]  ;;  %v2064_v36 = vld [vmem:[%s2490_s7 + $0x18] sm:$0xff]  ;;  %vm154_vm9 = vcmask 1041409  }
   0x3   :  { %v69_v2 = vmul.f32 %v2018_v1, %v65_v0  ;;  %v2025_v4 = vld [vmem:[%s2487_s1] sm:$0x3]  ;;  %139 = vmatpush.bf16.msra.mxu1 %v2038_v16  ;;  %179 = vmatpush.bf16.msra.mxu2 %v2059_v35  ;;  %v2071_v37 = vld [vmem:[%s2489_s8 + $0x18] sm:$0xff]  ;;  %v2083_v39 = vld [vmem:[%s2490_s7 + $0x10] sm:$0xff] }
   0x4   :  { %v33_v13 = vld [vmem:[%s2488_s0] sm:$0xf]  ;;  %v2090_v40 = vld [vmem:[%s2489_s8 + $0x10] sm:$0xff]  ;;  %v2097_v41 = vld [vmem:[%s2490_s7 + $0x28] sm:$0xff] }
   0x5   :  { %v71_v3 = vsel %vm70_vm0, %v69_v2, 0.0  ;;  %v2036_v15 = vsel %vm109_vm2, %v33_v13, 0  ;;  %v2053_v33 = vld [vmem:[%s2489_s8] sm:$0xff]  ;;  %v2102_v42 = vld [vmem:[%s2489_s8 + $0x28] sm:$0xff] }
   0x6   :  { %72 = vadd.xlane.f32.xlu0 %v71_v3  ;;  %120 = vmatpush.bf16.msra.mxu0 %v2036_v15  ;;  %v2078_v38 = vld [vmem:[%s2490_s7] sm:$0xff] }
   0x7   :  { %209 = vmatpush.bf16.msra.mxu3 %v2053_v33  ;;  %261 = vmatpush.bf16.msrb.mxu1 %v2071_v37  ;;  %v2110_v43 = vld [vmem:[%s2490_s7 + $0x20] sm:$0xff] }
   0x8   :  { %180 = vmatpush.bf16.msra.mxu2 %v2078_v38  ;;  %v2116_v44 = vld [vmem:[%s2489_s8 + $0x20] sm:$0xff] }
   0x9   :  { %v148_v63 = vld [vmem:[%s2491_s4] sm:$0x3] }
   0xa   :  { %235 = vmatpush.bf16.msrb.mxu0 %v2064_v36  ;;  %1700 = vmatmul.msk.bf16.vlgmr.msra.gmra.mxu3 %vm169_vm8, %v147_v34  ;;  %v216_v14 = vld [vmem:[%s2493_s5] sm:$0x3] }
   0xb   :  { %262 = vmatpush.bf16.msrb.mxu1 %v2090_v40  ;;  %314 = vmatpush.bf16.msrb.mxu3 %v2102_v42 }
   0xc   :  { %288 = vmatpush.bf16.msrb.mxu2 %v2097_v41 }
   0xe   :  { %236 = vmatpush.bf16.msrb.mxu0 %v2083_v39 }
   0xf   :  { %315 = vmatpush.bf16.msrb.mxu3 %v2116_v44 }
  0x10   :  { %289 = vmatpush.bf16.msrb.mxu2 %v2110_v43 }
  0x13   :  { %469 = vmatpush.bf16.msra.mxu3 %v2045_v17 }
  0x17   :  { %470 = vmatpush.bf16.msra.mxu3 %v2053_v33 }
  0x1a   :  { %1736 = vmatmul.msk.bf16.vlgmr.msrb.gmra.mxu3 %vm169_vm8, %v147_v34 }
  0x1b   :  { %529 = vmatpush.bf16.msrb.mxu3 %v2102_v42 }
  0x1f   :  { %530 = vmatpush.bf16.msrb.mxu3 %v2116_v44 }
  0x79   :  { %v73_v5 = vpop.xlane.xlu0 %72 }
  0x7a   :  { %v74_v6 = vadd.f32 %v73_v5, %v2025_v4 }
  0x7c   :  { %v76_v7 = vsel %vm75_vm1, %v74_v6, -inf }
  0x7d   :  { %77 = vmax.xlane.f32.xlu0 %v76_v7 }
  0x8d   :  { %v211_v56 = vpop.f32.mrf.mxu3 }
  0x95   :  { %v213_v58 = vpop.f32.mrf.mxu3 }
  0x9d   :  { %v317_v60 = vpop.f32.mrf.mxu3 }
  0xa5   :  { %v319_v61 = vpop.f32.mrf.mxu3 }
  0xf0   :  { %v78_v8 = vpop.xlane.xlu0 %77 }
  0xf1   :  { %v79_v9 = vsub.f32 %v74_v6, %v78_v8 }
  0xf3   :  { %v80_v10 = vmul.f32 1.442695, %v79_v9 }
  0xf5   :  { %1836 = vpow2.f32 %v80_v10  ;;  %v269_v10 = vld [vmem:[%s2492_s6] sm:$0x3] }
  0xfb   :  { %v1837_v11 = vpop.eup %1836 }
  0xfc   :  { %v82_v12 = vsel %vm75_vm1, %v1837_v11, 0.0 }
  0xfd   :  { %83 = vadd.xlane.f32.xlu1 %v82_v12 }
 0x170   :  { %v84_v18 = vpop.xlane.xlu1 %83 }
 0x171   :  { %1838 = vrcp.f32 %v84_v18  ;;  %v96_v22 = vand.u32 2147483648, %v84_v18  ;;  %v94_v24 = vand.u32 2147483647, %v84_v18  ;;  %vm90_vm4 = vweird.f32 %v84_v18 }
 0x173   :  { %v97_v26 = vor.u32 1.1754944e-38, %v96_v22  ;;  %vm95_vm6 = vcmp.eq.f32.partialorder %v94_v24, 8.507059e+37 }
 0x177   :  { %v1839_v19 = vpop.eup %1838 }
 0x178   :  { %v86_v20 = vmul.f32 %v1839_v19, %v84_v18  ;;  %vm91_vm3 = vweird.f32 %v1839_v19 }
 0x179   :  { %vm92_vm5 = vmor %vm90_vm4, %vm91_vm3 }
 0x17a   :  { %v87_v21 = vsub.f32 1.0, %v86_v20 }
 0x17c   :  { %v88_v23 = vmul.f32 %v1839_v19, %v87_v21 }
 0x17e   :  { %v89_v25 = vadd.f32 %v1839_v19, %v88_v23 }
 0x180   :  { %v93_v27 = vsel %vm92_vm5, %v1839_v19, %v89_v25 }
 0x181   :  { %v98_v28 = vsel %vm95_vm6, %v97_v26, %v93_v27 }
 0x182   :  { %v99_v29 = vmul.f32 %v1837_v11, %v98_v28 }
 0x184   :  { %v103_v30 = vpack.c.bf16 %v99_v29, %v99_v29  ;;  %v101_v31 = vrot.slane %v99_v29, 1 }
 0x186   :  { %1681 = vmatmul.msk.bf16.vlgmr.msra.gmra.mxu0 %vm105_vm7, %v103_v30  ;;  %v104_v32 = vpack.c.bf16 %v101_v31, %v101_v31 }
 0x187   :  { %409 = vmatpush.bf16.msra.mxu0 %v2036_v15 }
 0x188   :  { %1682 = vmatmul.msk.bf16.vlgmr.msra.gmra.mxu1 %vm105_vm7, %v104_v32 }
 0x189   :  { %425 = vmatpush.bf16.msra.mxu1 %v2038_v16 }
 0x198   :  { %1718 = vmatmul.msk.bf16.vlgmr.msrb.gmra.mxu1 %vm169_vm8, %v147_v34 }
 0x199   :  { %499 = vmatpush.bf16.msrb.mxu1 %v2071_v37 }
 0x19d   :  { %500 = vmatpush.bf16.msrb.mxu1 %v2090_v40 }
 0x203   :  { %v122_v45 = vpop.f32.mrf.mxu0 }
 0x204   :  { %v145_v47 = vpack.c.bf16 %v122_v45, %v122_v45 }
 0x205   :  { %v141_v46 = vpop.f32.mrf.mxu1 }
 0x206   :  { %v146_v48 = vpack.c.bf16 %v141_v46, %v141_v46  ;;  %v151_v50 = vunpack.c.l.b16 %v145_v47 }
 0x208   :  { %v152_v49 = vunpack.c.l.b16 %v146_v48 }
 0x20a   :  { %v153_v51 = vrot.slane %v152_v49, 7 }
 0x20b   :  { %v124_v52 = vpop.f32.mrf.mxu0 }
 0x20c   :  { %v155_v53 = vsel %vm154_vm9, %v153_v51, %v151_v50 }
 0x20d   :  { %v143_v54 = vpop.f32.mrf.mxu1  ;;  %v156_v55 = vpack.c.b16 %v155_v53, %v155_v53 }
 0x20f   :  { %1691 = vmatmul.msk.bf16.vlgmr.msra.gmra.mxu2 %vm169_vm8, %v156_v55  ;;  %1709 = vmatmul.msk.bf16.vlgmr.msrb.gmra.mxu0 %vm169_vm8, %v156_v55 }
 0x210   :  { %452 = vmatpush.bf16.msra.mxu2 %v2059_v35  ;;  %485 = vmatpush.bf16.msrb.mxu0 %v2064_v36 }
 0x214   :  { %453 = vmatpush.bf16.msra.mxu2 %v2078_v38  ;;  %486 = vmatpush.bf16.msrb.mxu0 %v2083_v39 }
 0x215   :  { %v264_v57 = vpop.f32.mrf.mxu1 }
 0x21d   :  { %v266_v59 = vpop.f32.mrf.mxu1 }
 0x21f   :  { %1727 = vmatmul.msk.bf16.vlgmr.msrb.gmra.mxu2 %vm169_vm8, %v156_v55 }
 0x220   :  { %515 = vmatpush.bf16.msrb.mxu2 %v2097_v41 }
 0x224   :  { %516 = vmatpush.bf16.msrb.mxu2 %v2110_v43 }
 0x28c   :  { %v238_v62 = vpop.f32.mrf.mxu0 }
 0x28d   :  { %v242_v20 = vadd.f32 %v238_v62, %v216_v14 }
 0x28f   :  { %v268_v24 = vadd.f32 %v264_v57, %v242_v20 }
 0x292   :  { %v182_v0 = vpop.f32.mrf.mxu2 }
 0x293   :  { %v186_v2 = vadd.f32 %v182_v0, %v148_v63 }
 0x294   :  { %v240_v3 = vpop.f32.mrf.mxu0 }
 0x295   :  { %v215_v5 = vadd.f32 %v211_v56, %v186_v2 }
 0x297   :  { %v1737_v6 = vmul.f32 -1.442695, %v215_v5 }
 0x299   :  { %1840 = vpow2.f32 %v1737_v6 }
 0x29a   :  { %v184_v7 = vpop.f32.mrf.mxu2 }
 0x29f   :  { %v1841_v8 = vpop.eup %1840 }
 0x2a0   :  { %v325_v9 = vadd.f32 1.0, %v1841_v8 }
 0x2a2   :  { %1842 = vrcp.f32 %v325_v9  ;;  %v291_v11 = vpop.f32.mrf.mxu2  ;;  %v337_v28 = vand.u32 2147483648, %v325_v9  ;;  %vm331_vm11 = vweird.f32 %v325_v9  ;;  %v335_v29 = vand.u32 2147483647, %v325_v9 }
 0x2a3   :  { %v295_v12 = vadd.f32 %v291_v11, %v269_v10 }
 0x2a4   :  { %v338_v32 = vor.u32 1.1754944e-38, %v337_v28  ;;  %vm336_vm13 = vcmp.eq.f32.partialorder %v335_v29, 8.507059e+37 }
 0x2a5   :  { %v321_v13 = vadd.f32 %v317_v60, %v295_v12 }
 0x2a7   :  { %v1738_v18 = vmul.f32 -1.442695, %v321_v13 }
 0x2a8   :  { %v1843_v19 = vpop.eup %1842 }
 0x2a9   :  { %v327_v21 = vmul.f32 %v1843_v19, %v325_v9  ;;  %1844 = vpow2.f32 %v1738_v18  ;;  %vm332_vm10 = vweird.f32 %v1843_v19 }
 0x2aa   :  { %v293_v22 = vpop.f32.mrf.mxu2  ;;  %1846 = vtanh.f32 %v268_v24  ;;  %vm333_vm12 = vmor %vm331_vm11, %vm332_vm10 }
 0x2ab   :  { %v328_v23 = vsub.f32 1.0, %v327_v21 }
 0x2ad   :  { %v329_v25 = vmul.f32 %v1843_v19, %v328_v23 }
 0x2af   :  { %v1845_v26 = vpop.eup %1844  ;;  %v330_v27 = vadd.f32 %v1843_v19, %v329_v25 }
 0x2b0   :  { %v345_v30 = vadd.f32 1.0, %v1845_v26  ;;  %v1847_v45 = vpop.eup %1846 }
 0x2b1   :  { %v334_v31 = vsel %vm333_vm12, %v1843_v19, %v330_v27 }
 0x2b2   :  { %1848 = vrcp.f32 %v345_v30  ;;  %v339_v34 = vsel %vm336_vm13, %v338_v32, %v334_v31  ;;  %v357_v50 = vand.u32 2147483648, %v345_v30  ;;  %v355_v52 = vand.u32 2147483647, %v345_v30 }
 0x2b3   :  { %v361_v47 = vmul.f32 %v1847_v45, %v339_v34  ;;  %vm351_vm15 = vweird.f32 %v345_v30 }
 0x2b4   :  { %v358_v54 = vor.u32 1.1754944e-38, %v357_v50  ;;  %vm356_vm3 = vcmp.eq.f32.partialorder %v355_v52, 8.507059e+37 }
 0x2b5   :  { %1850 = vtanh.f32 %v361_v47 }
 0x2b8   :  { %v1849_v46 = vpop.eup %1848 }
 0x2b9   :  { %v347_v48 = vmul.f32 %v1849_v46, %v345_v30  ;;  %vm352_vm14 = vweird.f32 %v1849_v46 }
 0x2ba   :  { %vm353_vm2 = vmor %vm351_vm15, %vm352_vm14 }
 0x2bb   :  { %v348_v49 = vsub.f32 1.0, %v347_v48  ;;  %v1851_v56 = vpop.eup %1850 }
 0x2bd   :  { %v349_v51 = vmul.f32 %v1849_v46, %v348_v49 }
 0x2bf   :  { %v350_v53 = vadd.f32 %v1849_v46, %v349_v51 }
 0x2c1   :  { %v354_v55 = vsel %vm353_vm2, %v1849_v46, %v350_v53 }
 0x2c2   :  { %v359_v57 = vsel %vm356_vm3, %v358_v54, %v354_v55  ;;  %v1741_v55 = vld [vmem:[%s2491_s4 + $0x2] sm:$0x3] }
 0x2c3   :  { %v363_v58 = vmul.f32 %v1851_v56, %v359_v57 }
 0x2c5   :  { %364 = vst.msk [vmem:[%s2494_s9] sm:$0x3] %vm70_vm0, %v363_v58  ;;  %v433_v59 = vpack.c.bf16 %v363_v58, %v363_v58  ;;  %v365_v60 = vmul.f32 %v2018_v1, %v363_v58 }
 0x2c7   :  { %1743 = vmatmul.msk.bf16.vlgmr.msra.gmra.mxu3 %vm169_vm8, %v433_v59  ;;  %v366_v61 = vsel %vm70_vm0, %v365_v60, 0.0 }
 0x2c8   :  { %367 = vadd.xlane.f32.xlu1 %v366_v61  ;;  %685 = vmatpush.bf16.msra.mxu3 %v2045_v17 }
 0x2cc   :  { %686 = vmatpush.bf16.msra.mxu3 %v2053_v33 }
 0x2d7   :  { %1749 = vmatmul.msk.bf16.vlgmr.msrb.gmra.mxu3 %vm169_vm8, %v433_v59 }
 0x2d8   :  { %745 = vmatpush.bf16.msrb.mxu3 %v2102_v42 }
 0x2dc   :  { %746 = vmatpush.bf16.msrb.mxu3 %v2116_v44 }
 0x33b   :  { %v368_v62 = vpop.xlane.xlu1 %367 }
 0x33c   :  { %v369_v63 = vadd.f32 %v368_v62, %v2025_v4 }
 0x33e   :  { %v370_v0 = vsel %vm75_vm1, %v369_v63, -inf }
 0x33f   :  { %371 = vmax.xlane.f32.xlu2 %v370_v0  ;;  %v1747_v0 = vld [vmem:[%s2492_s6 + $0x2] sm:$0x3] }
 0x34a   :  { %v2160_v2 = vpop.f32.mrf.mxu3 }
 0x352   :  { %v474_v3 = vpop.f32.mrf.mxu3 }
 0x35a   :  { %v2162_v5 = vpop.f32.mrf.mxu3 }
 0x362   :  { %v534_v6 = vpop.f32.mrf.mxu3 }
 0x3b2   :  { %v372_v7 = vpop.xlane.xlu2 %371 }
 0x3b3   :  { %v373_v8 = vsub.f32 %v369_v63, %v372_v7 }
 0x3b5   :  { %v374_v9 = vmul.f32 1.442695, %v373_v8  ;;  %v1744_v8 = vld [vmem:[%s2493_s5 + $0x2] sm:$0x3] }
 0x3b7   :  { %1852 = vpow2.f32 %v374_v9 }
 0x3bd   :  { %v1853_v10 = vpop.eup %1852 }
 0x3be   :  { %v376_v11 = vsel %vm75_vm1, %v1853_v10, 0.0 }
 0x3bf   :  { %377 = vadd.xlane.f32.xlu2 %v376_v11 }
 0x432   :  { %v378_v12 = vpop.xlane.xlu2 %377 }
 0x433   :  { %1854 = vrcp.f32 %v378_v12  ;;  %v390_v19 = vand.u32 2147483648, %v378_v12  ;;  %v388_v21 = vand.u32 2147483647, %v378_v12  ;;  %vm384_vm5 = vweird.f32 %v378_v12 }
 0x435   :  { %v391_v23 = vor.u32 1.1754944e-38, %v390_v19  ;;  %vm389_vm10 = vcmp.eq.f32.partialorder %v388_v21, 8.507059e+37 }
 0x439   :  { %v1855_v13 = vpop.eup %1854 }
 0x43a   :  { %v380_v14 = vmul.f32 %v1855_v13, %v378_v12  ;;  %vm385_vm4 = vweird.f32 %v1855_v13 }
 0x43b   :  { %vm386_vm6 = vmor %vm384_vm5, %vm385_vm4 }
 0x43c   :  { %v381_v18 = vsub.f32 1.0, %v380_v14 }
 0x43e   :  { %v382_v20 = vmul.f32 %v1855_v13, %v381_v18 }
 0x440   :  { %v383_v22 = vadd.f32 %v1855_v13, %v382_v20 }
 0x442   :  { %v387_v24 = vsel %vm386_vm6, %v1855_v13, %v383_v22 }
 0x443   :  { %v392_v25 = vsel %vm389_vm10, %v391_v23, %v387_v24 }
 0x444   :  { %v393_v26 = vmul.f32 %v1853_v10, %v392_v25 }
 0x446   :  { %v397_v27 = vpack.c.bf16 %v393_v26, %v393_v26  ;;  %v395_v28 = vrot.slane %v393_v26, 1 }
 0x448   :  { %1739 = vmatmul.msk.bf16.vlgmr.msra.gmra.mxu0 %vm105_vm7, %v397_v27  ;;  %v398_v29 = vpack.c.bf16 %v395_v28, %v395_v28 }
 0x449   :  { %625 = vmatpush.bf16.msra.mxu0 %v2036_v15 }
 0x44a   :  { %1740 = vmatmul.msk.bf16.vlgmr.msra.gmra.mxu1 %vm105_vm7, %v398_v29 }
 0x44b   :  { %641 = vmatpush.bf16.msra.mxu1 %v2038_v16 }
 0x45a   :  { %1746 = vmatmul.msk.bf16.vlgmr.msrb.gmra.mxu1 %vm169_vm8, %v433_v59 }
 0x45b   :  { %715 = vmatpush.bf16.msrb.mxu1 %v2071_v37 }
 0x45f   :  { %716 = vmatpush.bf16.msrb.mxu1 %v2090_v40 }
 0x4c5   :  { %v411_v30 = vpop.f32.mrf.mxu0 }
 0x4c6   :  { %v431_v32 = vpack.c.bf16 %v411_v30, %v411_v30 }
 0x4c7   :  { %v427_v31 = vpop.f32.mrf.mxu1 }
 0x4c8   :  { %v432_v34 = vpack.c.bf16 %v427_v31, %v427_v31  ;;  %v438_v46 = vunpack.c.l.b16 %v431_v32 }
 0x4ca   :  { %v439_v45 = vunpack.c.l.b16 %v432_v34 }
 0x4cc   :  { %v440_v47 = vrot.slane %v439_v45, 7 }
 0x4cd   :  { %v413_v48 = vpop.f32.mrf.mxu0 }
 0x4ce   :  { %v441_v49 = vsel %vm154_vm9, %v440_v47, %v438_v46 }
 0x4cf   :  { %v442_v50 = vpack.c.b16 %v441_v49, %v441_v49  ;;  %v429_v51 = vpop.f32.mrf.mxu1 }
 0x4d1   :  { %1742 = vmatmul.msk.bf16.vlgmr.msra.gmra.mxu2 %vm169_vm8, %v442_v50  ;;  %1745 = vmatmul.msk.bf16.vlgmr.msrb.gmra.mxu0 %vm169_vm8, %v442_v50 }
 0x4d2   :  { %668 = vmatpush.bf16.msra.mxu2 %v2059_v35  ;;  %701 = vmatpush.bf16.msrb.mxu0 %v2064_v36 }
 0x4d6   :  { %669 = vmatpush.bf16.msra.mxu2 %v2078_v38  ;;  %702 = vmatpush.bf16.msrb.mxu0 %v2083_v39 }
 0x4d7   :  { %v502_v52 = vpop.f32.mrf.mxu1 }
 0x4df   :  { %v504_v53 = vpop.f32.mrf.mxu1 }
 0x4e1   :  { %1748 = vmatmul.msk.bf16.vlgmr.msrb.gmra.mxu2 %vm169_vm8, %v442_v50 }
 0x4e2   :  { %731 = vmatpush.bf16.msrb.mxu2 %v2097_v41 }
 0x4e6   :  { %732 = vmatpush.bf16.msrb.mxu2 %v2110_v43 }
 0x54e   :  { %v488_v54 = vpop.f32.mrf.mxu0 }
 0x54f   :  { %v492_v10 = vadd.f32 %v1744_v8, %v488_v54 }
 0x551   :  { %v506_v14 = vadd.f32 %v502_v52, %v492_v10 }
 0x554   :  { %v455_v56 = vpop.f32.mrf.mxu2 }
 0x555   :  { %v459_v57 = vadd.f32 %v1741_v55, %v455_v56 }
 0x556   :  { %v490_v58 = vpop.f32.mrf.mxu0 }
 0x557   :  { %v476_v59 = vadd.f32 %v2160_v2, %v459_v57 }
 0x559   :  { %v1750_v60 = vmul.f32 -1.442695, %v476_v59 }
 0x55b   :  { %1856 = vpow2.f32 %v1750_v60 }
 0x55c   :  { %v457_v61 = vpop.f32.mrf.mxu2 }
 0x561   :  { %v1857_v62 = vpop.eup %1856 }
 0x562   :  { %v540_v63 = vadd.f32 1.0, %v1857_v62 }
 0x564   :  { %1858 = vrcp.f32 %v540_v63  ;;  %v518_v3 = vpop.f32.mrf.mxu2  ;;  %v552_v21 = vand.u32 2147483648, %v540_v63  ;;  %vm546_vm12 = vweird.f32 %v540_v63  ;;  %v550_v22 = vand.u32 2147483647, %v540_v63 }
 0x565   :  { %v522_v6 = vadd.f32 %v1747_v0, %v518_v3 }
 0x566   :  { %v553_v24 = vor.u32 1.1754944e-38, %v552_v21  ;;  %vm551_vm14 = vcmp.eq.f32.partialorder %v550_v22, 8.507059e+37 }
 0x567   :  { %v536_v7 = vadd.f32 %v2162_v5, %v522_v6 }
 0x569   :  { %v1751_v9 = vmul.f32 -1.442695, %v536_v7 }
 0x56a   :  { %v1859_v2 = vpop.eup %1858 }
 0x56b   :  { %v542_v11 = vmul.f32 %v1859_v2, %v540_v63  ;;  %1860 = vpow2.f32 %v1751_v9  ;;  %vm547_vm11 = vweird.f32 %v1859_v2 }
 0x56c   :  { %v520_v12 = vpop.f32.mrf.mxu2  ;;  %1862 = vtanh.f32 %v506_v14  ;;  %vm548_vm13 = vmor %vm546_vm12, %vm547_vm11 }
 0x56d   :  { %v543_v13 = vsub.f32 1.0, %v542_v11 }
 0x56f   :  { %v544_v18 = vmul.f32 %v1859_v2, %v543_v13 }
 0x571   :  { %v1861_v19 = vpop.eup %1860  ;;  %v545_v20 = vadd.f32 %v1859_v2, %v544_v18 }
 0x572   :  { %v560_v5 = vadd.f32 1.0, %v1861_v19  ;;  %v1863_v26 = vpop.eup %1862 }
 0x573   :  { %v549_v23 = vsel %vm548_vm13, %v1859_v2, %v545_v20 }
 0x574   :  { %1864 = vrcp.f32 %v560_v5  ;;  %v554_v25 = vsel %vm551_vm14, %v553_v24, %v549_v23  ;;  %v572_v31 = vand.u32 2147483648, %v560_v5  ;;  %v570_v34 = vand.u32 2147483647, %v560_v5 }
 0x575   :  { %v576_v28 = vmul.f32 %v1863_v26, %v554_v25  ;;  %vm566_vm2 = vweird.f32 %v560_v5 }
 0x576   :  { %v573_v46 = vor.u32 1.1754944e-38, %v572_v31  ;;  %vm571_vm4 = vcmp.eq.f32.partialorder %v570_v34, 8.507059e+37 }
 0x577   :  { %1866 = vtanh.f32 %v576_v28 }
 0x57a   :  { %v1865_v27 = vpop.eup %1864 }
 0x57b   :  { %v562_v29 = vmul.f32 %v1865_v27, %v560_v5  ;;  %vm567_vm15 = vweird.f32 %v1865_v27 }
 0x57c   :  { %vm568_vm3 = vmor %vm566_vm2, %vm567_vm15 }
 0x57d   :  { %v563_v30 = vsub.f32 1.0, %v562_v29  ;;  %v1867_v48 = vpop.eup %1866 }
 0x57f   :  { %v564_v32 = vmul.f32 %v1865_v27, %v563_v30 }
 0x581   :  { %v565_v45 = vadd.f32 %v1865_v27, %v564_v32 }
 0x583   :  { %v569_v47 = vsel %vm568_vm3, %v1865_v27, %v565_v45 }
 0x584   :  { %v574_v49 = vsel %vm571_vm4, %v573_v46, %v569_v47  ;;  %v1755_v47 = vld [vmem:[%s2491_s4 + $0x4] sm:$0x3] }
 0x585   :  { %v578_v50 = vmul.f32 %v1867_v48, %v574_v49 }
 0x587   :  { %1752 = vst.msk [vmem:[%s2494_s9 + $0x2] sm:$0x3] %vm70_vm0, %v578_v50  ;;  %v649_v51 = vpack.c.bf16 %v578_v50, %v578_v50  ;;  %v581_v52 = vmul.f32 %v2018_v1, %v578_v50 }
 0x589   :  { %1757 = vmatmul.msk.bf16.vlgmr.msra.gmra.mxu3 %vm169_vm8, %v649_v51  ;;  %v582_v53 = vsel %vm70_vm0, %v581_v52, 0.0 }
 0x58a   :  { %583 = vadd.xlane.f32.xlu0 %v582_v53  ;;  %901 = vmatpush.bf16.msra.mxu3 %v2045_v17 }
 0x58e   :  { %902 = vmatpush.bf16.msra.mxu3 %v2053_v33 }
 0x599   :  { %1763 = vmatmul.msk.bf16.vlgmr.msrb.gmra.mxu3 %vm169_vm8, %v649_v51 }
 0x59a   :  { %961 = vmatpush.bf16.msrb.mxu3 %v2102_v42 }
 0x59e   :  { %962 = vmatpush.bf16.msrb.mxu3 %v2116_v44 }
 0x5fd   :  { %v584_v54 = vpop.xlane.xlu0 %583 }
 0x5fe   :  { %v585_v55 = vadd.f32 %v584_v54, %v2025_v4 }
 0x600   :  { %v586_v56 = vsel %vm75_vm1, %v585_v55, -inf }
 0x601   :  { %587 = vmax.xlane.f32.xlu1 %v586_v56  ;;  %v1761_v56 = vld [vmem:[%s2492_s6 + $0x4] sm:$0x3] }
 0x60c   :  { %v2207_v57 = vpop.f32.mrf.mxu3 }
 0x614   :  { %v690_v58 = vpop.f32.mrf.mxu3 }
 0x61c   :  { %v2209_v59 = vpop.f32.mrf.mxu3 }
 0x624   :  { %v750_v60 = vpop.f32.mrf.mxu3 }
 0x674   :  { %v588_v61 = vpop.xlane.xlu1 %587 }
 0x675   :  { %v589_v62 = vsub.f32 %v585_v55, %v588_v61 }
 0x677   :  { %v590_v63 = vmul.f32 1.442695, %v589_v62  ;;  %v1758_v62 = vld [vmem:[%s2493_s5 + $0x4] sm:$0x3] }
 0x679   :  { %1868 = vpow2.f32 %v590_v63 }
 0x67f   :  { %v1869_v0 = vpop.eup %1868 }
 0x680   :  { %v592_v3 = vsel %vm75_vm1, %v1869_v0, 0.0 }
 0x681   :  { %593 = vadd.xlane.f32.xlu2 %v592_v3 }
 0x6f4   :  { %v594_v6 = vpop.xlane.xlu2 %593 }
 0x6f5   :  { %1870 = vrcp.f32 %v594_v6  ;;  %v606_v2 = vand.u32 2147483648, %v594_v6  ;;  %v604_v11 = vand.u32 2147483647, %v594_v6  ;;  %vm600_vm6 = vweird.f32 %v594_v6 }
 0x6f7   :  { %v607_v13 = vor.u32 1.1754944e-38, %v606_v2  ;;  %vm605_vm11 = vcmp.eq.f32.partialorder %v604_v11, 8.507059e+37 }
 0x6fb   :  { %v1871_v7 = vpop.eup %1870 }
 0x6fc   :  { %v596_v8 = vmul.f32 %v1871_v7, %v594_v6  ;;  %vm601_vm5 = vweird.f32 %v1871_v7 }
 0x6fd   :  { %vm602_vm10 = vmor %vm600_vm6, %vm601_vm5 }
 0x6fe   :  { %v597_v9 = vsub.f32 1.0, %v596_v8 }
 0x700   :  { %v598_v10 = vmul.f32 %v1871_v7, %v597_v9 }
 0x702   :  { %v599_v12 = vadd.f32 %v1871_v7, %v598_v10 }
 0x704   :  { %v603_v14 = vsel %vm602_vm10, %v1871_v7, %v599_v12 }
 0x705   :  { %v608_v18 = vsel %vm605_vm11, %v607_v13, %v603_v14 }
 0x706   :  { %v609_v19 = vmul.f32 %v1869_v0, %v608_v18 }
 0x708   :  { %v613_v20 = vpack.c.bf16 %v609_v19, %v609_v19  ;;  %v611_v21 = vrot.slane %v609_v19, 1 }
 0x70a   :  { %1753 = vmatmul.msk.bf16.vlgmr.msra.gmra.mxu0 %vm105_vm7, %v613_v20  ;;  %v614_v22 = vpack.c.bf16 %v611_v21, %v611_v21 }
 0x70b   :  { %841 = vmatpush.bf16.msra.mxu0 %v2036_v15 }
 0x70c   :  { %1754 = vmatmul.msk.bf16.vlgmr.msra.gmra.mxu1 %vm105_vm7, %v614_v22 }
 0x70d   :  { %857 = vmatpush.bf16.msra.mxu1 %v2038_v16 }
 0x71c   :  { %1760 = vmatmul.msk.bf16.vlgmr.msrb.gmra.mxu1 %vm169_vm8, %v649_v51 }
 0x71d   :  { %931 = vmatpush.bf16.msrb.mxu1 %v2071_v37 }
 0x721   :  { %932 = vmatpush.bf16.msrb.mxu1 %v2090_v40 }
 0x787   :  { %v627_v5 = vpop.f32.mrf.mxu0 }
 0x788   :  { %v647_v24 = vpack.c.bf16 %v627_v5, %v627_v5 }
 0x789   :  { %v643_v23 = vpop.f32.mrf.mxu1 }
 0x78a   :  { %v648_v25 = vpack.c.bf16 %v643_v23, %v643_v23  ;;  %v654_v27 = vunpack.c.l.b16 %v647_v24 }
 0x78c   :  { %v655_v26 = vunpack.c.l.b16 %v648_v25 }
 0x78e   :  { %v656_v28 = vrot.slane %v655_v26, 7 }
 0x78f   :  { %v629_v29 = vpop.f32.mrf.mxu0 }
 0x790   :  { %v657_v30 = vsel %vm154_vm9, %v656_v28, %v654_v27 }
 0x791   :  { %v658_v31 = vpack.c.b16 %v657_v30, %v657_v30  ;;  %v645_v32 = vpop.f32.mrf.mxu1 }
 0x793   :  { %1756 = vmatmul.msk.bf16.vlgmr.msra.gmra.mxu2 %vm169_vm8, %v658_v31  ;;  %1759 = vmatmul.msk.bf16.vlgmr.msrb.gmra.mxu0 %vm169_vm8, %v658_v31 }
 0x794   :  { %884 = vmatpush.bf16.msra.mxu2 %v2059_v35  ;;  %917 = vmatpush.bf16.msrb.mxu0 %v2064_v36 }
 0x798   :  { %885 = vmatpush.bf16.msra.mxu2 %v2078_v38  ;;  %918 = vmatpush.bf16.msrb.mxu0 %v2083_v39 }
 0x799   :  { %v718_v34 = vpop.f32.mrf.mxu1 }
 0x7a1   :  { %v720_v45 = vpop.f32.mrf.mxu1 }
 0x7a3   :  { %1762 = vmatmul.msk.bf16.vlgmr.msrb.gmra.mxu2 %vm169_vm8, %v658_v31 }
 0x7a4   :  { %947 = vmatpush.bf16.msrb.mxu2 %v2097_v41 }
 0x7a8   :  { %948 = vmatpush.bf16.msrb.mxu2 %v2110_v43 }
 0x810   :  { %v704_v46 = vpop.f32.mrf.mxu0 }
 0x811   :  { %v708_v0 = vadd.f32 %v1758_v62, %v704_v46 }
 0x813   :  { %v722_v8 = vadd.f32 %v718_v34, %v708_v0 }
 0x816   :  { %v671_v48 = vpop.f32.mrf.mxu2 }
 0x817   :  { %v675_v49 = vadd.f32 %v1755_v47, %v671_v48 }
 0x818   :  { %v706_v50 = vpop.f32.mrf.mxu0 }
 0x819   :  { %v692_v51 = vadd.f32 %v2207_v57, %v675_v49 }
 0x81b   :  { %v1764_v52 = vmul.f32 -1.442695, %v692_v51 }
 0x81d   :  { %1872 = vpow2.f32 %v1764_v52 }
 0x81e   :  { %v673_v53 = vpop.f32.mrf.mxu2 }
 0x823   :  { %v1873_v54 = vpop.eup %1872 }
 0x824   :  { %v756_v55 = vadd.f32 1.0, %v1873_v54 }
 0x826   :  { %1874 = vrcp.f32 %v756_v55  ;;  %v734_v58 = vpop.f32.mrf.mxu2  ;;  %v768_v11 = vand.u32 2147483648, %v756_v55  ;;  %vm762_vm13 = vweird.f32 %v756_v55  ;;  %v766_v12 = vand.u32 2147483647, %v756_v55 }
 0x827   :  { %v738_v60 = vadd.f32 %v1761_v56, %v734_v58 }
 0x828   :  { %v769_v14 = vor.u32 1.1754944e-38, %v768_v11  ;;  %vm767_vm15 = vcmp.eq.f32.partialorder %v766_v12, 8.507059e+37 }
 0x829   :  { %v752_v61 = vadd.f32 %v2209_v59, %v738_v60 }
 0x82b   :  { %v1765_v63 = vmul.f32 -1.442695, %v752_v61 }
 0x82c   :  { %v1875_v57 = vpop.eup %1874 }
 0x82d   :  { %v758_v3 = vmul.f32 %v1875_v57, %v756_v55  ;;  %1876 = vpow2.f32 %v1765_v63  ;;  %vm763_vm12 = vweird.f32 %v1875_v57 }
 0x82e   :  { %v736_v6 = vpop.f32.mrf.mxu2  ;;  %1878 = vtanh.f32 %v722_v8  ;;  %vm764_vm14 = vmor %vm762_vm13, %vm763_vm12 }
 0x82f   :  { %v759_v7 = vsub.f32 1.0, %v758_v3 }
 0x831   :  { %v760_v9 = vmul.f32 %v1875_v57, %v759_v7 }
 0x833   :  { %v1877_v2 = vpop.eup %1876  ;;  %v761_v10 = vadd.f32 %v1875_v57, %v760_v9 }
 0x834   :  { %v776_v59 = vadd.f32 1.0, %v1877_v2  ;;  %v1879_v19 = vpop.eup %1878 }
 0x835   :  { %v765_v13 = vsel %vm764_vm14, %v1875_v57, %v761_v10 }
 0x836   :  { %1880 = vrcp.f32 %v776_v59  ;;  %v770_v18 = vsel %vm767_vm15, %v769_v14, %v765_v13  ;;  %v788_v23 = vand.u32 2147483648, %v776_v59  ;;  %v786_v25 = vand.u32 2147483647, %v776_v59 }
 0x837   :  { %v792_v21 = vmul.f32 %v1879_v19, %v770_v18  ;;  %vm782_vm3 = vweird.f32 %v776_v59 }
 0x838   :  { %v789_v27 = vor.u32 1.1754944e-38, %v788_v23  ;;  %vm787_vm5 = vcmp.eq.f32.partialorder %v786_v25, 8.507059e+37 }
 0x839   :  { %1882 = vtanh.f32 %v792_v21  ;;  %v1769_v21 = vld [vmem:[%s2491_s4 + $0x6] sm:$0x3] }
 0x83c   :  { %v1881_v20 = vpop.eup %1880 }
 0x83d   :  { %v778_v22 = vmul.f32 %v1881_v20, %v776_v59  ;;  %vm783_vm2 = vweird.f32 %v1881_v20 }
 0x83e   :  { %vm784_vm4 = vmor %vm782_vm3, %vm783_vm2 }
 0x83f   :  { %v779_v5 = vsub.f32 1.0, %v778_v22  ;;  %v1883_v29 = vpop.eup %1882 }
 0x841   :  { %v780_v24 = vmul.f32 %v1881_v20, %v779_v5 }
 0x843   :  { %v781_v26 = vadd.f32 %v1881_v20, %v780_v24 }
 0x845   :  { %v785_v28 = vsel %vm784_vm4, %v1881_v20, %v781_v26 }
 0x846   :  { %v790_v30 = vsel %vm787_vm5, %v789_v27, %v785_v28  ;;  %v1772_v27 = vld [vmem:[%s2493_s5 + $0x6] sm:$0x3] }
 0x847   :  { %v794_v31 = vmul.f32 %v1883_v29, %v790_v30 }
 0x849   :  { %1766 = vst.msk [vmem:[%s2494_s9 + $0x4] sm:$0x3] %vm70_vm0, %v794_v31  ;;  %v865_v32 = vpack.c.bf16 %v794_v31, %v794_v31  ;;  %v797_v34 = vmul.f32 %v2018_v1, %v794_v31 }
 0x84b   :  { %1771 = vmatmul.msk.bf16.vlgmr.msra.gmra.mxu3 %vm169_vm8, %v865_v32  ;;  %v798_v45 = vsel %vm70_vm0, %v797_v34, 0.0 }
 0x84c   :  { %799 = vadd.xlane.f32.xlu0 %v798_v45  ;;  %1117 = vmatpush.bf16.msra.mxu3 %v2045_v17 }
 0x850   :  { %1118 = vmatpush.bf16.msra.mxu3 %v2053_v33 }
 0x85b   :  { %1777 = vmatmul.msk.bf16.vlgmr.msrb.gmra.mxu3 %vm169_vm8, %v865_v32 }
 0x85c   :  { %1177 = vmatpush.bf16.msrb.mxu3 %v2102_v42 }
 0x860   :  { %1178 = vmatpush.bf16.msrb.mxu3 %v2116_v44 }
 0x8bf   :  { %v800_v46 = vpop.xlane.xlu0 %799 }
 0x8c0   :  { %v801_v47 = vadd.f32 %v800_v46, %v2025_v4 }
 0x8c2   :  { %v802_v1 = vsel %vm75_vm1, %v801_v47, -inf }
 0x8c3   :  { %803 = vmax.xlane.f32.xlu1 %v802_v1 }
 0x8ce   :  { %v2254_v48 = vpop.f32.mrf.mxu3 }
 0x8d6   :  { %v906_v49 = vpop.f32.mrf.mxu3 }
 0x8de   :  { %v2256_v50 = vpop.f32.mrf.mxu3 }
 0x8e6   :  { %v966_v17 = vpop.f32.mrf.mxu3 }
 0x936   :  { %v804_v51 = vpop.xlane.xlu1 %803 }
 0x937   :  { %v805_v33 = vsub.f32 %v801_v47, %v804_v51 }
 0x939   :  { %v806_v52 = vmul.f32 1.442695, %v805_v33 }
 0x93b   :  { %1884 = vpow2.f32 %v806_v52 }
 0x941   :  { %v1885_v53 = vpop.eup %1884 }
 0x942   :  { %v808_v42 = vsel %vm75_vm1, %v1885_v53, 0.0 }
 0x943   :  { %809 = vadd.xlane.f32.xlu2 %v808_v42 }
 0x9b6   :  { %v810_v44 = vpop.xlane.xlu2 %809 }
 0x9b7   :  { %1886 = vrcp.f32 %v810_v44  ;;  %v822_v56 = vand.u32 2147483648, %v810_v44  ;;  %v820_v60 = vand.u32 2147483647, %v810_v44  ;;  %vm816_vm10 = vweird.f32 %v810_v44 }
 0x9b9   :  { %v823_v62 = vor.u32 1.1754944e-38, %v822_v56  ;;  %vm821_vm12 = vcmp.eq.f32.partialorder %v820_v60, 8.507059e+37 }
 0x9bd   :  { %v1887_v4 = vpop.eup %1886 }
 0x9be   :  { %v812_v54 = vmul.f32 %v1887_v4, %v810_v44  ;;  %vm817_vm6 = vweird.f32 %v1887_v4 }
 0x9bf   :  { %vm818_vm11 = vmor %vm816_vm10, %vm817_vm6 }
 0x9c0   :  { %v813_v55 = vsub.f32 1.0, %v812_v54 }
 0x9c2   :  { %v814_v58 = vmul.f32 %v1887_v4, %v813_v55 }
 0x9c4   :  { %v815_v61 = vadd.f32 %v1887_v4, %v814_v58 }
 0x9c6   :  { %v819_v63 = vsel %vm818_vm11, %v1887_v4, %v815_v61 }
 0x9c7   :  { %v824_v57 = vsel %vm821_vm12, %v823_v62, %v819_v63 }
 0x9c8   :  { %v825_v0 = vmul.f32 %v1885_v53, %v824_v57 }
 0x9ca   :  { %v829_v3 = vpack.c.bf16 %v825_v0, %v825_v0  ;;  %v827_v6 = vrot.slane %v825_v0, 1 }
 0x9cc   :  { %1767 = vmatmul.msk.bf16.vlgmr.msra.gmra.mxu0 %vm105_vm7, %v829_v3  ;;  %v830_v7 = vpack.c.bf16 %v827_v6, %v827_v6  ;;  %v2294_v3 = vld [vmem:[%s2486_s3] ss:$0 sm:$0xff] }
 0x9cd   :  { %1057 = vmatpush.bf16.msra.mxu0 %v2036_v15 }
 0x9ce   :  { %1768 = vmatmul.msk.bf16.vlgmr.msra.gmra.mxu1 %vm105_vm7, %v830_v7 }
 0x9cf   :  { %1073 = vmatpush.bf16.msra.mxu1 %v2038_v16 }
 0x9de   :  { %1774 = vmatmul.msk.bf16.vlgmr.msrb.gmra.mxu1 %vm169_vm8, %v865_v32 }
 0x9df   :  { %1147 = vmatpush.bf16.msrb.mxu1 %v2071_v37 }
 0x9e3   :  { %1148 = vmatpush.bf16.msrb.mxu1 %v2090_v40 }
 0xa49   :  { %v843_v8 = vpop.f32.mrf.mxu0 }
 0xa4a   :  { %v863_v2 = vpack.c.bf16 %v843_v8, %v843_v8  ;;  %v2302_v8 = vld [vmem:[%s2489_s8 + $0x8] sm:$0xff] }
 0xa4b   :  { %v859_v9 = vpop.f32.mrf.mxu1 }
 0xa4c   :  { %v864_v10 = vpack.c.bf16 %v859_v9, %v859_v9  ;;  %v870_v12 = vunpack.c.l.b16 %v863_v2  ;;  %v2308_v9 = vld [vmem:[%s2489_s8] sm:$0xff]  ;;  %v2315_v2 = vld [vmem:[%s2489_s8 + $0x28] sm:$0xff] }
 0xa4e   :  { %v871_v11 = vunpack.c.l.b16 %v864_v10  ;;  %v2321_v10 = vld [vmem:[%s2489_s8 + $0x20] sm:$0xff] }
 0xa50   :  { %v872_v59 = vrot.slane %v871_v11, 7 }
 0xa51   :  { %v845_v13 = vpop.f32.mrf.mxu0 }
 0xa52   :  { %v873_v14 = vsel %vm154_vm9, %v872_v59, %v870_v12  ;;  %v2327_v12 = vld [vmem:[%s2487_s1] sm:$0x3] }
 0xa53   :  { %v874_v18 = vpack.c.b16 %v873_v14, %v873_v14  ;;  %v861_v19 = vpop.f32.mrf.mxu1 }
 0xa55   :  { %1770 = vmatmul.msk.bf16.vlgmr.msra.gmra.mxu2 %vm169_vm8, %v874_v18  ;;  %1773 = vmatmul.msk.bf16.vlgmr.msrb.gmra.mxu0 %vm169_vm8, %v874_v18 }
 0xa56   :  { %1100 = vmatpush.bf16.msra.mxu2 %v2059_v35  ;;  %1133 = vmatpush.bf16.msrb.mxu0 %v2064_v36 }
 0xa5a   :  { %1101 = vmatpush.bf16.msra.mxu2 %v2078_v38  ;;  %1134 = vmatpush.bf16.msrb.mxu0 %v2083_v39 }
 0xa5b   :  { %v934_v37 = vpop.f32.mrf.mxu1 }
 0xa63   :  { %v936_v40 = vpop.f32.mrf.mxu1 }
 0xa65   :  { %1776 = vmatmul.msk.bf16.vlgmr.msrb.gmra.mxu2 %vm169_vm8, %v874_v18 }
 0xa66   :  { %1163 = vmatpush.bf16.msrb.mxu2 %v2097_v41  ;;  %v1775_v41 = vld [vmem:[%s2492_s6 + $0x6] sm:$0x3] }
 0xa6a   :  { %1164 = vmatpush.bf16.msrb.mxu2 %v2110_v43 }
 0xad2   :  { %v920_v20 = vpop.f32.mrf.mxu0 }
 0xad3   :  { %v924_v30 = vadd.f32 %v1772_v27, %v920_v20 }
 0xad5   :  { %v938_v45 = vadd.f32 %v934_v37, %v924_v30 }
 0xad8   :  { %v887_v35 = vpop.f32.mrf.mxu2 }
 0xad9   :  { %v891_v22 = vadd.f32 %v1769_v21, %v887_v35 }
 0xada   :  { %v922_v36 = vpop.f32.mrf.mxu0 }
 0xadb   :  { %v908_v38 = vadd.f32 %v2254_v48, %v891_v22 }
 0xadd   :  { %v1778_v5 = vmul.f32 -1.442695, %v908_v38 }
 0xadf   :  { %1888 = vpow2.f32 %v1778_v5 }
 0xae0   :  { %v889_v39 = vpop.f32.mrf.mxu2 }
 0xae5   :  { %v1889_v23 = vpop.eup %1888 }
 0xae6   :  { %v972_v24 = vadd.f32 1.0, %v1889_v23 }
 0xae8   :  { %1890 = vrcp.f32 %v972_v24  ;;  %v950_v43 = vpop.f32.mrf.mxu2  ;;  %v984_v48 = vand.u32 2147483648, %v972_v24  ;;  %vm978_vm14 = vweird.f32 %v972_v24  ;;  %v982_v49 = vand.u32 2147483647, %v972_v24 }
 0xae9   :  { %v954_v25 = vadd.f32 %v1775_v41, %v950_v43 }
 0xaea   :  { %v985_v51 = vor.u32 1.1754944e-38, %v984_v48  ;;  %vm983_vm2 = vcmp.eq.f32.partialorder %v982_v49, 8.507059e+37 }
 0xaeb   :  { %v968_v26 = vadd.f32 %v2256_v50, %v954_v25 }
 0xaed   :  { %v1779_v28 = vmul.f32 -1.442695, %v968_v26 }
 0xaee   :  { %v1891_v29 = vpop.eup %1890 }
 0xaef   :  { %v974_v31 = vmul.f32 %v1891_v29, %v972_v24  ;;  %1892 = vpow2.f32 %v1779_v28  ;;  %vm979_vm13 = vweird.f32 %v1891_v29 }
 0xaf0   :  { %v952_v32 = vpop.f32.mrf.mxu2  ;;  %1894 = vtanh.f32 %v938_v45  ;;  %vm980_vm15 = vmor %vm978_vm14, %vm979_vm13 }
 0xaf1   :  { %v975_v34 = vsub.f32 1.0, %v974_v31  ;;  %v2344_v32 = vld [vmem:[%s2489_s8 + $0x18] sm:$0xff] }
 0xaf3   :  { %v976_v46 = vmul.f32 %v1891_v29, %v975_v34  ;;  %v2350_v34 = vld [vmem:[%s2489_s8 + $0x10] sm:$0xff] }
 0xaf5   :  { %v1893_v47 = vpop.eup %1892  ;;  %v977_v1 = vadd.f32 %v1891_v29, %v976_v46 }
 0xaf6   :  { %v992_v50 = vadd.f32 1.0, %v1893_v47  ;;  %v1895_v52 = vpop.eup %1894 }
 0xaf7   :  { %v981_v17 = vsel %vm980_vm15, %v1891_v29, %v977_v1 }
 0xaf8   :  { %1896 = vrcp.f32 %v992_v50  ;;  %v986_v33 = vsel %vm983_vm2, %v985_v51, %v981_v17  ;;  %v1004_v54 = vand.u32 2147483648, %v992_v50  ;;  %v1002_v56 = vand.u32 2147483647, %v992_v50 }
 0xaf9   :  { %v1008_v42 = vmul.f32 %v1895_v52, %v986_v33  ;;  %vm998_vm4 = vweird.f32 %v992_v50 }
 0xafa   :  { %v1005_v60 = vor.u32 1.1754944e-38, %v1004_v54  ;;  %vm1003_vm6 = vcmp.eq.f32.partialorder %v1002_v56, 8.507059e+37  ;;  %v2384_v56 = vld [vmem:[%s2490_s7 + $0x28] sm:$0xff] }
 0xafb   :  { %1898 = vtanh.f32 %v1008_v42  ;;  %v2365_v42 = vld [vmem:[%s2490_s7 + $0x18] sm:$0xff] }
 0xafe   :  { %v1897_v53 = vpop.eup %1896 }
 0xaff   :  { %v994_v44 = vmul.f32 %v1897_v53, %v992_v50  ;;  %vm999_vm3 = vweird.f32 %v1897_v53 }
 0xb00   :  { %vm1000_vm5 = vmor %vm998_vm4, %vm999_vm3 }
 0xb01   :  { %v995_v4 = vsub.f32 1.0, %v994_v44  ;;  %v1899_v62 = vpop.eup %1898  ;;  %v2371_v44 = vld [vmem:[%s2490_s7] sm:$0xff] }
 0xb03   :  { %v996_v55 = vmul.f32 %v1897_v53, %v995_v4  ;;  %v2377_v4 = vld [vmem:[%s2490_s7 + $0x10] sm:$0xff] }
 0xb05   :  { %v997_v58 = vadd.f32 %v1897_v53, %v996_v55 }
 0xb07   :  { %v1001_v61 = vsel %vm1000_vm5, %v1897_v53, %v997_v58  ;;  %v2359_v53 = vld [vmem:[%s2490_s7 + $0x8] sm:$0xff]  ;;  %v2390_v58 = vld [vmem:[%s2490_s7 + $0x20] sm:$0xff] }
 0xb08   :  { %v1006_v63 = vsel %vm1003_vm6, %v1005_v60, %v1001_v61  ;;  %v1783_v61 = vld [vmem:[%s2491_s4 + $0x8] sm:$0x3] }
 0xb09   :  { %v1010_v57 = vmul.f32 %v1899_v62, %v1006_v63 }
 0xb0b   :  { %1780 = vst.msk [vmem:[%s2494_s9 + $0x6] sm:$0x3] %vm70_vm0, %v1010_v57  ;;  %v1081_v0 = vpack.c.bf16 %v1010_v57, %v1010_v57  ;;  %v1013_v6 = vmul.f32 %v2294_v3, %v1010_v57 }
 0xb0d   :  { %1785 = vmatmul.msk.bf16.vlgmr.msra.gmra.mxu3 %vm169_vm8, %v1081_v0  ;;  %v1014_v7 = vsel %vm70_vm0, %v1013_v6, 0.0 }
 0xb0e   :  { %1015 = vadd.xlane.f32.xlu0 %v1014_v7  ;;  %1333 = vmatpush.bf16.msra.mxu3 %v2302_v8 }
 0xb12   :  { %1334 = vmatpush.bf16.msra.mxu3 %v2308_v9 }
 0xb1d   :  { %1791 = vmatmul.msk.bf16.vlgmr.msrb.gmra.mxu3 %vm169_vm8, %v1081_v0 }
 0xb1e   :  { %1393 = vmatpush.bf16.msrb.mxu3 %v2315_v2 }
 0xb22   :  { %1394 = vmatpush.bf16.msrb.mxu3 %v2321_v10 }
 0xb81   :  { %v1016_v11 = vpop.xlane.xlu0 %1015 }
 0xb82   :  { %v1017_v59 = vadd.f32 %v2327_v12, %v1016_v11 }
 0xb84   :  { %v1018_v13 = vsel %vm75_vm1, %v1017_v59, -inf }
 0xb85   :  { %1019 = vmax.xlane.f32.xlu1 %v1018_v13  ;;  %v1789_v13 = vld [vmem:[%s2492_s6 + $0x8] sm:$0x3] }
 0xb90   :  { %v2331_v14 = vpop.f32.mrf.mxu3 }
 0xb98   :  { %v1122_v18 = vpop.f32.mrf.mxu3 }
 0xba0   :  { %v2333_v19 = vpop.f32.mrf.mxu3 }
 0xba8   :  { %v1182_v37 = vpop.f32.mrf.mxu3 }
 0xbf8   :  { %v1020_v40 = vpop.xlane.xlu1 %1019 }
 0xbf9   :  { %v1021_v20 = vsub.f32 %v1017_v59, %v1020_v40 }
 0xbfb   :  { %v1022_v21 = vmul.f32 1.442695, %v1021_v20  ;;  %v1786_v20 = vld [vmem:[%s2493_s5 + $0x8] sm:$0x3] }
 0xbfd   :  { %1900 = vpow2.f32 %v1022_v21 }
 0xc03   :  { %v1901_v35 = vpop.eup %1900 }
 0xc04   :  { %v1024_v22 = vsel %vm75_vm1, %v1901_v35, 0.0 }
 0xc05   :  { %1025 = vadd.xlane.f32.xlu2 %v1024_v22 }
 0xc78   :  { %v1026_v36 = vpop.xlane.xlu2 %1025 }
 0xc79   :  { %1902 = vrcp.f32 %v1026_v36  ;;  %v1038_v23 = vand.u32 2147483648, %v1026_v36  ;;  %v1036_v41 = vand.u32 2147483647, %v1026_v36  ;;  %vm1032_vm11 = vweird.f32 %v1026_v36 }
 0xc7b   :  { %v1039_v25 = vor.u32 1.1754944e-38, %v1038_v23  ;;  %vm1037_vm13 = vcmp.eq.f32.partialorder %v1036_v41, 8.507059e+37 }
 0xc7f   :  { %v1903_v38 = vpop.eup %1902 }
 0xc80   :  { %v1028_v5 = vmul.f32 %v1903_v38, %v1026_v36  ;;  %vm1033_vm10 = vweird.f32 %v1903_v38 }
 0xc81   :  { %vm1034_vm12 = vmor %vm1032_vm11, %vm1033_vm10 }
 0xc82   :  { %v1029_v39 = vsub.f32 1.0, %v1028_v5 }
 0xc84   :  { %v1030_v24 = vmul.f32 %v1903_v38, %v1029_v39 }
 0xc86   :  { %v1031_v43 = vadd.f32 %v1903_v38, %v1030_v24 }
 0xc88   :  { %v1035_v26 = vsel %vm1034_vm12, %v1903_v38, %v1031_v43 }
 0xc89   :  { %v1040_v27 = vsel %vm1037_vm13, %v1039_v25, %v1035_v26 }
 0xc8a   :  { %v1041_v28 = vmul.f32 %v1901_v35, %v1040_v27 }
 0xc8c   :  { %v1045_v29 = vpack.c.bf16 %v1041_v28, %v1041_v28  ;;  %v1043_v30 = vrot.slane %v1041_v28, 1 }
 0xc8e   :  { %1781 = vmatmul.msk.bf16.vlgmr.msra.gmra.mxu0 %vm105_vm7, %v1045_v29  ;;  %v1046_v31 = vpack.c.bf16 %v1043_v30, %v1043_v30 }
 0xc8f   :  { %1273 = vmatpush.bf16.msra.mxu0 %v2036_v15 }
 0xc90   :  { %1782 = vmatmul.msk.bf16.vlgmr.msra.gmra.mxu1 %vm105_vm7, %v1046_v31 }
 0xc91   :  { %1289 = vmatpush.bf16.msra.mxu1 %v2038_v16 }
 0xca0   :  { %1788 = vmatmul.msk.bf16.vlgmr.msrb.gmra.mxu1 %vm169_vm8, %v1081_v0 }
 0xca1   :  { %1363 = vmatpush.bf16.msrb.mxu1 %v2344_v32 }
 0xca5   :  { %1364 = vmatpush.bf16.msrb.mxu1 %v2350_v34 }
 0xd0b   :  { %v1059_v45 = vpop.f32.mrf.mxu0 }
 0xd0c   :  { %v1079_v47 = vpack.c.bf16 %v1059_v45, %v1059_v45 }
 0xd0d   :  { %v1075_v46 = vpop.f32.mrf.mxu1 }
 0xd0e   :  { %v1080_v1 = vpack.c.bf16 %v1075_v46, %v1075_v46  ;;  %v1086_v49 = vunpack.c.l.b16 %v1079_v47 }
 0xd10   :  { %v1087_v48 = vunpack.c.l.b16 %v1080_v1 }
 0xd12   :  { %v1088_v50 = vrot.slane %v1087_v48, 7 }
 0xd13   :  { %v1061_v17 = vpop.f32.mrf.mxu0 }
 0xd14   :  { %v1089_v51 = vsel %vm154_vm9, %v1088_v50, %v1086_v49 }
 0xd15   :  { %v1090_v33 = vpack.c.b16 %v1089_v51, %v1089_v51  ;;  %v1077_v52 = vpop.f32.mrf.mxu1 }
 0xd17   :  { %1784 = vmatmul.msk.bf16.vlgmr.msra.gmra.mxu2 %vm169_vm8, %v1090_v33  ;;  %1787 = vmatmul.msk.bf16.vlgmr.msrb.gmra.mxu0 %vm169_vm8, %v1090_v33 }
 0xd18   :  { %1316 = vmatpush.bf16.msra.mxu2 %v2359_v53  ;;  %1349 = vmatpush.bf16.msrb.mxu0 %v2365_v42 }
 0xd1c   :  { %1317 = vmatpush.bf16.msra.mxu2 %v2371_v44  ;;  %1350 = vmatpush.bf16.msrb.mxu0 %v2377_v4 }
 0xd1d   :  { %v1150_v54 = vpop.f32.mrf.mxu1 }
 0xd25   :  { %v1152_v55 = vpop.f32.mrf.mxu1 }
 0xd27   :  { %1790 = vmatmul.msk.bf16.vlgmr.msrb.gmra.mxu2 %vm169_vm8, %v1090_v33 }
 0xd28   :  { %1379 = vmatpush.bf16.msrb.mxu2 %v2384_v56 }
 0xd2c   :  { %1380 = vmatpush.bf16.msrb.mxu2 %v2390_v58 }
 0xd94   :  { %v1136_v60 = vpop.f32.mrf.mxu0 }
 0xd95   :  { %v1140_v35 = vadd.f32 %v1786_v20, %v1136_v60 }
 0xd97   :  { %v1154_v5 = vadd.f32 %v1150_v54, %v1140_v35 }
 0xd9a   :  { %v1103_v62 = vpop.f32.mrf.mxu2 }
 0xd9b   :  { %v1107_v63 = vadd.f32 %v1783_v61, %v1103_v62 }
 0xd9c   :  { %v1138_v57 = vpop.f32.mrf.mxu0 }
 0xd9d   :  { %v1124_v0 = vadd.f32 %v2331_v14, %v1107_v63 }
 0xd9f   :  { %v1792_v6 = vmul.f32 -1.442695, %v1124_v0 }
 0xda1   :  { %1904 = vpow2.f32 %v1792_v6 }
 0xda2   :  { %v1105_v7 = vpop.f32.mrf.mxu2 }
 0xda7   :  { %v1905_v11 = vpop.eup %1904 }
 0xda8   :  { %v1188_v59 = vadd.f32 1.0, %v1905_v11 }
 0xdaa   :  { %1906 = vrcp.f32 %v1188_v59  ;;  %v1166_v18 = vpop.f32.mrf.mxu2  ;;  %v1200_v41 = vand.u32 2147483648, %v1188_v59  ;;  %vm1194_vm15 = vweird.f32 %v1188_v59  ;;  %v1198_v43 = vand.u32 2147483647, %v1188_v59 }
 0xdab   :  { %v1170_v37 = vadd.f32 %v1789_v13, %v1166_v18 }
 0xdac   :  { %v1201_v26 = vor.u32 1.1754944e-38, %v1200_v41  ;;  %vm1199_vm3 = vcmp.eq.f32.partialorder %v1198_v43, 8.507059e+37 }
 0xdad   :  { %v1184_v40 = vadd.f32 %v2333_v19, %v1170_v37 }
 0xdaf   :  { %v1793_v21 = vmul.f32 -1.442695, %v1184_v40 }
 0xdb0   :  { %v1907_v14 = vpop.eup %1906 }
 0xdb1   :  { %v1190_v22 = vmul.f32 %v1907_v14, %v1188_v59  ;;  %1908 = vpow2.f32 %v1793_v21  ;;  %vm1195_vm14 = vweird.f32 %v1907_v14 }
 0xdb2   :  { %v1168_v36 = vpop.f32.mrf.mxu2  ;;  %1910 = vtanh.f32 %v1154_v5  ;;  %vm1196_vm2 = vmor %vm1194_vm15, %vm1195_vm14 }
 0xdb3   :  { %v1191_v38 = vsub.f32 1.0, %v1190_v22 }
 0xdb5   :  { %v1192_v39 = vmul.f32 %v1907_v14, %v1191_v38 }
 0xdb7   :  { %v1909_v23 = vpop.eup %1908  ;;  %v1193_v24 = vadd.f32 %v1907_v14, %v1192_v39 }
 0xdb8   :  { %v1208_v19 = vadd.f32 1.0, %v1909_v23  ;;  %v1911_v28 = vpop.eup %1910 }
 0xdb9   :  { %v1197_v25 = vsel %vm1196_vm2, %v1907_v14, %v1193_v24 }
 0xdba   :  { %1912 = vrcp.f32 %v1208_v19  ;;  %v1202_v27 = vsel %vm1199_vm3, %v1201_v26, %v1197_v25  ;;  %v1220_v46 = vand.u32 2147483648, %v1208_v19  ;;  %v1218_v1 = vand.u32 2147483647, %v1208_v19 }
 0xdbb   :  { %v1224_v30 = vmul.f32 %v1911_v28, %v1202_v27  ;;  %vm1214_vm5 = vweird.f32 %v1208_v19 }
 0xdbc   :  { %v1221_v49 = vor.u32 1.1754944e-38, %v1220_v46  ;;  %vm1219_vm10 = vcmp.eq.f32.partialorder %v1218_v1, 8.507059e+37 }
 0xdbd   :  { %1914 = vtanh.f32 %v1224_v30  ;;  %v1797_v30 = vld [vmem:[%s2491_s4 + $0xa] sm:$0x3] }
 0xdc0   :  { %v1913_v29 = vpop.eup %1912 }
 0xdc1   :  { %v1210_v31 = vmul.f32 %v1913_v29, %v1208_v19  ;;  %vm1215_vm4 = vweird.f32 %v1913_v29 }
 0xdc2   :  { %vm1216_vm6 = vmor %vm1214_vm5, %vm1215_vm4 }
 0xdc3   :  { %v1211_v45 = vsub.f32 1.0, %v1210_v31  ;;  %v1915_v17 = vpop.eup %1914 }
 0xdc5   :  { %v1212_v47 = vmul.f32 %v1913_v29, %v1211_v45 }
 0xdc7   :  { %v1213_v48 = vadd.f32 %v1913_v29, %v1212_v47 }
 0xdc9   :  { %v1217_v50 = vsel %vm1216_vm6, %v1913_v29, %v1213_v48 }
 0xdca   :  { %v1222_v51 = vsel %vm1219_vm10, %v1221_v49, %v1217_v50  ;;  %v1800_v49 = vld [vmem:[%s2493_s5 + $0xa] sm:$0x3] }
 0xdcb   :  { %v1226_v33 = vmul.f32 %v1915_v17, %v1222_v51 }
 0xdcd   :  { %1794 = vst.msk [vmem:[%s2494_s9 + $0x8] sm:$0x3] %vm70_vm0, %v1226_v33  ;;  %v1297_v52 = vpack.c.bf16 %v1226_v33, %v1226_v33  ;;  %v1229_v54 = vmul.f32 %v2294_v3, %v1226_v33 }
 0xdcf   :  { %1799 = vmatmul.msk.bf16.vlgmr.msra.gmra.mxu3 %vm169_vm8, %v1297_v52  ;;  %v1230_v55 = vsel %vm70_vm0, %v1229_v54, 0.0 }
 0xdd0   :  { %1231 = vadd.xlane.f32.xlu0 %v1230_v55  ;;  %1549 = vmatpush.bf16.msra.mxu3 %v2302_v8 }
 0xdd4   :  { %1550 = vmatpush.bf16.msra.mxu3 %v2308_v9 }
 0xddf   :  { %1805 = vmatmul.msk.bf16.vlgmr.msrb.gmra.mxu3 %vm169_vm8, %v1297_v52 }
 0xde0   :  { %1609 = vmatpush.bf16.msrb.mxu3 %v2315_v2 }
 0xde4   :  { %1610 = vmatpush.bf16.msrb.mxu3 %v2321_v10 }
 0xe43   :  { %v1232_v60 = vpop.xlane.xlu0 %1231 }
 0xe44   :  { %v1233_v61 = vadd.f32 %v2327_v12, %v1232_v60 }
 0xe46   :  { %v1234_v62 = vsel %vm75_vm1, %v1233_v61, -inf }
 0xe47   :  { %1235 = vmax.xlane.f32.xlu1 %v1234_v62 }
 0xe52   :  { %v2418_v63 = vpop.f32.mrf.mxu3 }
 0xe5a   :  { %v1338_v57 = vpop.f32.mrf.mxu3 }
 0xe62   :  { %v2420_v0 = vpop.f32.mrf.mxu3 }
 0xe6a   :  { %v1398_v8 = vpop.f32.mrf.mxu3 }
 0xeba   :  { %v1236_v6 = vpop.xlane.xlu1 %1235 }
 0xebb   :  { %v1237_v9 = vsub.f32 %v1233_v61, %v1236_v6 }
 0xebd   :  { %v1238_v7 = vmul.f32 1.442695, %v1237_v9 }
 0xebf   :  { %1916 = vpow2.f32 %v1238_v7 }
 0xec5   :  { %v1917_v11 = vpop.eup %1916 }
 0xec6   :  { %v1240_v2 = vsel %vm75_vm1, %v1917_v11, 0.0 }
 0xec7   :  { %1241 = vadd.xlane.f32.xlu2 %v1240_v2 }
 0xf3a   :  { %v1242_v10 = vpop.xlane.xlu2 %1241 }
 0xf3b   :  { %1918 = vrcp.f32 %v1242_v10  ;;  %v1254_v37 = vand.u32 2147483648, %v1242_v10  ;;  %v1252_v20 = vand.u32 2147483647, %v1242_v10  ;;  %vm1248_vm12 = vweird.f32 %v1242_v10 }
 0xf3d   :  { %v1255_v14 = vor.u32 1.1754944e-38, %v1254_v37  ;;  %vm1253_vm14 = vcmp.eq.f32.partialorder %v1252_v20, 8.507059e+37 }
 0xf41   :  { %v1919_v59 = vpop.eup %1918 }
 0xf42   :  { %v1244_v13 = vmul.f32 %v1919_v59, %v1242_v10  ;;  %vm1249_vm11 = vweird.f32 %v1919_v59 }
 0xf43   :  { %vm1250_vm13 = vmor %vm1248_vm12, %vm1249_vm11 }
 0xf44   :  { %v1245_v18 = vsub.f32 1.0, %v1244_v13 }
 0xf46   :  { %v1246_v40 = vmul.f32 %v1919_v59, %v1245_v18 }
 0xf48   :  { %v1247_v21 = vadd.f32 %v1919_v59, %v1246_v40 }
 0xf4a   :  { %v1251_v35 = vsel %vm1250_vm13, %v1919_v59, %v1247_v21 }
 0xf4b   :  { %v1256_v22 = vsel %vm1253_vm14, %v1255_v14, %v1251_v35 }
 0xf4c   :  { %v1257_v36 = vmul.f32 %v1917_v11, %v1256_v22 }
 0xf4e   :  { %v1261_v38 = vpack.c.bf16 %v1257_v36, %v1257_v36  ;;  %v1259_v5 = vrot.slane %v1257_v36, 1 }
 0xf50   :  { %1795 = vmatmul.msk.bf16.vlgmr.msra.gmra.mxu0 %vm105_vm7, %v1261_v38  ;;  %v1262_v39 = vpack.c.bf16 %v1259_v5, %v1259_v5 }
 0xf51   :  { %1489 = vmatpush.bf16.msra.mxu0 %v2036_v15 }
 0xf52   :  { %1796 = vmatmul.msk.bf16.vlgmr.msra.gmra.mxu1 %vm105_vm7, %v1262_v39 }
 0xf53   :  { %1505 = vmatpush.bf16.msra.mxu1 %v2038_v16 }
 0xf62   :  { %1802 = vmatmul.msk.bf16.vlgmr.msrb.gmra.mxu1 %vm169_vm8, %v1297_v52 }
 0xf63   :  { %1579 = vmatpush.bf16.msrb.mxu1 %v2344_v32 }
 0xf67   :  { %1580 = vmatpush.bf16.msrb.mxu1 %v2350_v34 }
 0xfcd   :  { %v1275_v23 = vpop.f32.mrf.mxu0 }
 0xfce   :  { %v1295_v41 = vpack.c.bf16 %v1275_v23, %v1275_v23 }
 0xfcf   :  { %v1291_v24 = vpop.f32.mrf.mxu1 }
 0xfd0   :  { %v1296_v43 = vpack.c.bf16 %v1291_v24, %v1291_v24  ;;  %v1302_v25 = vunpack.c.l.b16 %v1295_v41 }
 0xfd2   :  { %v1303_v19 = vunpack.c.l.b16 %v1296_v43 }
 0xfd4   :  { %v1304_v26 = vrot.slane %v1303_v19, 7 }
 0xfd5   :  { %v1277_v27 = vpop.f32.mrf.mxu0 }
 0xfd6   :  { %v1305_v15 = vsel %vm154_vm9, %v1304_v26, %v1302_v25 }
 0xfd7   :  { %v1306_v28 = vpack.c.b16 %v1305_v15, %v1305_v15  ;;  %v1293_v29 = vpop.f32.mrf.mxu1 }
 0xfd9   :  { %1798 = vmatmul.msk.bf16.vlgmr.msra.gmra.mxu2 %vm169_vm8, %v1306_v28  ;;  %1801 = vmatmul.msk.bf16.vlgmr.msrb.gmra.mxu0 %vm169_vm8, %v1306_v28 }
 0xfda   :  { %1532 = vmatpush.bf16.msra.mxu2 %v2359_v53  ;;  %1565 = vmatpush.bf16.msrb.mxu0 %v2365_v42 }
 0xfde   :  { %1533 = vmatpush.bf16.msra.mxu2 %v2371_v44  ;;  %1566 = vmatpush.bf16.msrb.mxu0 %v2377_v4 }
 0xfdf   :  { %v1366_v16 = vpop.f32.mrf.mxu1 }
 0xfe7   :  { %v1368_v32 = vpop.f32.mrf.mxu1 }
 0xfe9   :  { %1804 = vmatmul.msk.bf16.vlgmr.msrb.gmra.mxu2 %vm169_vm8, %v1306_v28 }
 0xfea   :  { %1595 = vmatpush.bf16.msrb.mxu2 %v2384_v56  ;;  %v1803_v56 = vld [vmem:[%s2492_s6 + $0xa] sm:$0x3] }
 0xfee   :  { %1596 = vmatpush.bf16.msrb.mxu2 %v2390_v58 }
0x1056   :  { %v1352_v34 = vpop.f32.mrf.mxu0 }
0x1057   :  { %v1356_v51 = vadd.f32 %v1800_v49, %v1352_v34 }
0x1059   :  { %v1370_v55 = vadd.f32 %v1366_v16, %v1356_v51 }
0x105c   :  { %v1319_v53 = vpop.f32.mrf.mxu2 }
0x105d   :  { %v1323_v31 = vadd.f32 %v1797_v30, %v1319_v53 }
0x105e   :  { %v1354_v42 = vpop.f32.mrf.mxu0 }
0x105f   :  { %v1340_v44 = vadd.f32 %v2418_v63, %v1323_v31 }
0x1061   :  { %v1806_v45 = vmul.f32 -1.442695, %v1340_v44 }
0x1063   :  { %1920 = vpow2.f32 %v1806_v45 }
0x1064   :  { %v1321_v4 = vpop.f32.mrf.mxu2 }
0x1069   :  { %v1921_v46 = vpop.eup %1920 }
0x106a   :  { %v1404_v47 = vadd.f32 1.0, %v1921_v46 }
0x106c   :  { %1922 = vrcp.f32 %v1404_v47  ;;  %v1382_v58 = vpop.f32.mrf.mxu2  ;;  %v1416_v63 = vand.u32 2147483648, %v1404_v47  ;;  %vm1410_vm2 = vweird.f32 %v1404_v47  ;;  %v1414_v57 = vand.u32 2147483647, %v1404_v47 }
0x106d   :  { %v1386_v1 = vadd.f32 %v1803_v56, %v1382_v58 }
0x106e   :  { %v1417_v6 = vor.u32 1.1754944e-38, %v1416_v63  ;;  %vm1415_vm4 = vcmp.eq.f32.partialorder %v1414_v57, 8.507059e+37  ;;  %v1811_v63 = vld [vmem:[%s2491_s4 + $0xc] sm:$0x3] }
0x106f   :  { %v1400_v48 = vadd.f32 %v2420_v0, %v1386_v1 }
0x1071   :  { %v1807_v50 = vmul.f32 -1.442695, %v1400_v48 }
0x1072   :  { %v1923_v17 = vpop.eup %1922 }
0x1073   :  { %v1406_v33 = vmul.f32 %v1923_v17, %v1404_v47  ;;  %1924 = vpow2.f32 %v1807_v50  ;;  %vm1411_vm15 = vweird.f32 %v1923_v17 }
0x1074   :  { %v1384_v52 = vpop.f32.mrf.mxu2  ;;  %1926 = vtanh.f32 %v1370_v55  ;;  %vm1412_vm3 = vmor %vm1410_vm2, %vm1411_vm15 }
0x1075   :  { %v1407_v54 = vsub.f32 1.0, %v1406_v33 }
0x1077   :  { %v1408_v60 = vmul.f32 %v1923_v17, %v1407_v54 }
0x1079   :  { %v1925_v61 = vpop.eup %1924  ;;  %v1409_v62 = vadd.f32 %v1923_v17, %v1408_v60 }
0x107a   :  { %v1424_v0 = vadd.f32 1.0, %v1925_v61  ;;  %v1927_v7 = vpop.eup %1926 }
0x107b   :  { %v1413_v8 = vsel %vm1412_vm3, %v1923_v17, %v1409_v62 }
0x107c   :  { %1928 = vrcp.f32 %v1424_v0  ;;  %v1418_v9 = vsel %vm1415_vm4, %v1417_v6, %v1413_v8  ;;  %v1436_v13 = vand.u32 2147483648, %v1424_v0  ;;  %v1434_v37 = vand.u32 2147483647, %v1424_v0 }
0x107d   :  { %v1440_v2 = vmul.f32 %v1927_v7, %v1418_v9  ;;  %vm1430_vm6 = vweird.f32 %v1424_v0 }
0x107e   :  { %v1437_v20 = vor.u32 1.1754944e-38, %v1436_v13  ;;  %vm1435_vm11 = vcmp.eq.f32.partialorder %v1434_v37, 8.507059e+37  ;;  %v1814_v37 = vld [vmem:[%s2493_s5 + $0xc] sm:$0x3] }
0x107f   :  { %1930 = vtanh.f32 %v1440_v2 }
0x1082   :  { %v1929_v11 = vpop.eup %1928 }
0x1083   :  { %v1426_v10 = vmul.f32 %v1929_v11, %v1424_v0  ;;  %vm1431_vm5 = vweird.f32 %v1929_v11 }
0x1084   :  { %vm1432_vm10 = vmor %vm1430_vm6, %vm1431_vm5 }
0x1085   :  { %v1427_v59 = vsub.f32 1.0, %v1426_v10  ;;  %v1931_v14 = vpop.eup %1930  ;;  %v1817_v10 = vld [vmem:[%s2492_s6 + $0xc] sm:$0x3] }
0x1087   :  { %v1428_v18 = vmul.f32 %v1929_v11, %v1427_v59 }
0x1089   :  { %v1429_v40 = vadd.f32 %v1929_v11, %v1428_v18 }
0x108b   :  { %v1433_v21 = vsel %vm1432_vm10, %v1929_v11, %v1429_v40 }
0x108c   :  { %v1438_v35 = vsel %vm1435_vm11, %v1437_v20, %v1433_v21 }
0x108d   :  { %v1442_v22 = vmul.f32 %v1931_v14, %v1438_v35 }
0x108f   :  { %1808 = vst.msk [vmem:[%s2494_s9 + $0xa] sm:$0x3] %vm70_vm0, %v1442_v22  ;;  %v1513_v36 = vpack.c.bf16 %v1442_v22, %v1442_v22  ;;  %v1445_v38 = vmul.f32 %v2294_v3, %v1442_v22 }
0x1091   :  { %1813 = vmatmul.msk.bf16.vlgmr.msra.gmra.mxu3 %vm169_vm8, %v1513_v36  ;;  %v1446_v5 = vsel %vm70_vm0, %v1445_v38, 0.0 }
0x1092   :  { %1447 = vadd.xlane.f32.xlu0 %v1446_v5 }
0x10a1   :  { %1819 = vmatmul.msk.bf16.vlgmr.msrb.gmra.mxu3 %vm169_vm8, %v1513_v36 }
0x1105   :  { %v1448_v39 = vpop.xlane.xlu0 %1447 }
0x1106   :  { %v1449_v23 = vadd.f32 %v2327_v12, %v1448_v39 }
0x1108   :  { %v1450_v24 = vsel %vm75_vm1, %v1449_v23, -inf }
0x1109   :  { %1451 = vmax.xlane.f32.xlu1 %v1450_v24 }
0x1114   :  { %v1552_v41 = vpop.f32.mrf.mxu3 }
0x111c   :  { %v1554_v43 = vpop.f32.mrf.mxu3 }
0x1124   :  { %v2461_v19 = vpop.f32.mrf.mxu3 }
0x112c   :  { %v1614_v25 = vpop.f32.mrf.mxu3 }
0x117c   :  { %v1452_v26 = vpop.xlane.xlu1 %1451 }
0x117d   :  { %v1453_v3 = vsub.f32 %v1449_v23, %v1452_v26 }
0x117f   :  { %v1454_v27 = vmul.f32 1.442695, %v1453_v3 }
0x1181   :  { %1932 = vpow2.f32 %v1454_v27 }
0x1187   :  { %v1933_v15 = vpop.eup %1932 }
0x1188   :  { %v1456_v28 = vsel %vm75_vm1, %v1933_v15, 0.0 }
0x1189   :  { %1457 = vadd.xlane.f32.xlu2 %v1456_v28 }
0x11fc   :  { %v1458_v29 = vpop.xlane.xlu2 %1457 }
0x11fd   :  { %1934 = vrcp.f32 %v1458_v29  ;;  %v1470_v34 = vand.u32 2147483648, %v1458_v29  ;;  %v1468_v53 = vand.u32 2147483647, %v1458_v29  ;;  %vm1464_vm13 = vweird.f32 %v1458_v29 }
0x11ff   :  { %v1471_v42 = vor.u32 1.1754944e-38, %v1470_v34  ;;  %vm1469_vm15 = vcmp.eq.f32.partialorder %v1468_v53, 8.507059e+37 }
0x1203   :  { %v1935_v16 = vpop.eup %1934 }
0x1204   :  { %v1460_v12 = vmul.f32 %v1935_v16, %v1458_v29  ;;  %vm1465_vm12 = vweird.f32 %v1935_v16 }
0x1205   :  { %vm1466_vm14 = vmor %vm1464_vm13, %vm1465_vm12 }
0x1206   :  { %v1461_v32 = vsub.f32 1.0, %v1460_v12 }
0x1208   :  { %v1462_v30 = vmul.f32 %v1935_v16, %v1461_v32 }
0x120a   :  { %v1463_v31 = vadd.f32 %v1935_v16, %v1462_v30 }
0x120c   :  { %v1467_v44 = vsel %vm1466_vm14, %v1935_v16, %v1463_v31 }
0x120d   :  { %v1472_v45 = vsel %vm1469_vm15, %v1471_v42, %v1467_v44 }
0x120e   :  { %v1473_v4 = vmul.f32 %v1933_v15, %v1472_v45 }
0x1210   :  { %v1475_v46 = vrot.slane %v1473_v4, 1  ;;  %v1477_v47 = vpack.c.bf16 %v1473_v4, %v1473_v4 }
0x1212   :  { %v1478_v56 = vpack.c.bf16 %v1475_v46, %v1475_v46  ;;  %1809 = vmatmul.msk.bf16.vlgmr.msra.gmra.mxu0 %vm105_vm7, %v1477_v47 }
0x1214   :  { %1810 = vmatmul.msk.bf16.vlgmr.msra.gmra.mxu1 %vm105_vm7, %v1478_v56 }
0x1224   :  { %1816 = vmatmul.msk.bf16.vlgmr.msrb.gmra.mxu1 %vm169_vm8, %v1513_v36 }
0x128f   :  { %v1491_v58 = vpop.f32.mrf.mxu0 }
0x1290   :  { %v1511_v48 = vpack.c.bf16 %v1491_v58, %v1491_v58 }
0x1291   :  { %v1507_v1 = vpop.f32.mrf.mxu1 }
0x1292   :  { %v1512_v49 = vpack.c.bf16 %v1507_v1, %v1507_v1  ;;  %v1518_v17 = vunpack.c.l.b16 %v1511_v48 }
0x1294   :  { %v1519_v50 = vunpack.c.l.b16 %v1512_v49 }
0x1296   :  { %v1520_v51 = vrot.slane %v1519_v50, 7 }
0x1297   :  { %v1493_v33 = vpop.f32.mrf.mxu0 }
0x1298   :  { %v1521_v52 = vsel %vm154_vm9, %v1520_v51, %v1518_v17 }
0x1299   :  { %v1522_v54 = vpack.c.b16 %v1521_v52, %v1521_v52  ;;  %v1509_v55 = vpop.f32.mrf.mxu1 }
0x129b   :  { %1812 = vmatmul.msk.bf16.vlgmr.msra.gmra.mxu2 %vm169_vm8, %v1522_v54  ;;  %1815 = vmatmul.msk.bf16.vlgmr.msrb.gmra.mxu0 %vm169_vm8, %v1522_v54 }
0x12a1   :  { %v1582_v60 = vpop.f32.mrf.mxu1 }
0x12a9   :  { %v1584_v61 = vpop.f32.mrf.mxu1 }
0x12ab   :  { %1818 = vmatmul.msk.bf16.vlgmr.msrb.gmra.mxu2 %vm169_vm8, %v1522_v54 }
0x1318   :  { %v1568_v62 = vpop.f32.mrf.mxu0 }
0x1319   :  { %v1572_v21 = vadd.f32 %v1814_v37, %v1568_v62 }
0x131b   :  { %v1586_v36 = vadd.f32 %v1582_v60, %v1572_v21 }
0x131e   :  { %v1535_v57 = vpop.f32.mrf.mxu2 }
0x131f   :  { %v1539_v0 = vadd.f32 %v1811_v63, %v1535_v57 }
0x1320   :  { %v1570_v8 = vpop.f32.mrf.mxu0 }
0x1321   :  { %v1556_v6 = vadd.f32 %v1552_v41, %v1539_v0 }
0x1323   :  { %v1820_v9 = vmul.f32 -1.442695, %v1556_v6 }
0x1325   :  { %1936 = vpow2.f32 %v1820_v9 }
0x1326   :  { %v1537_v7 = vpop.f32.mrf.mxu2 }
0x132b   :  { %v1937_v11 = vpop.eup %1936 }
0x132c   :  { %v1620_v2 = vadd.f32 1.0, %v1937_v11 }
0x132e   :  { %1938 = vrcp.f32 %v1620_v2  ;;  %v1598_v59 = vpop.f32.mrf.mxu2  ;;  %v1632_v23 = vand.u32 2147483648, %v1620_v2  ;;  %vm1626_vm7 = vweird.f32 %v1620_v2  ;;  %v1630_v24 = vand.u32 2147483647, %v1620_v2 }
0x132f   :  { %v1602_v13 = vadd.f32 %v1817_v10, %v1598_v59 }
0x1330   :  { %vm1631_vm9 = vcmp.eq.f32.partialorder %v1630_v24, 8.507059e+37 }
0x1331   :  { %v1616_v18 = vadd.f32 %v2461_v19, %v1602_v13  ;;  %v1633_v19 = vor.u32 1.1754944e-38, %v1632_v23 }
0x1333   :  { %v1821_v40 = vmul.f32 -1.442695, %v1616_v18 }
0x1334   :  { %v1939_v20 = vpop.eup %1938 }
0x1335   :  { %v1622_v14 = vmul.f32 %v1939_v20, %v1620_v2  ;;  %1940 = vpow2.f32 %v1821_v40  ;;  %vm1627_vm1 = vweird.f32 %v1939_v20 }
0x1336   :  { %v1600_v35 = vpop.f32.mrf.mxu2  ;;  %1942 = vtanh.f32 %v1586_v36  ;;  %vm1628_vm8 = vmor %vm1626_vm7, %vm1627_vm1 }
0x1337   :  { %v1623_v22 = vsub.f32 1.0, %v1622_v14 }
0x1339   :  { %v1624_v38 = vmul.f32 %v1939_v20, %v1623_v22 }
0x133b   :  { %v1941_v5 = vpop.eup %1940  ;;  %v1625_v39 = vadd.f32 %v1939_v20, %v1624_v38 }
0x133c   :  { %v1640_v41 = vadd.f32 1.0, %v1941_v5  ;;  %v1943_v26 = vpop.eup %1942 }
0x133d   :  { %v1629_v43 = vsel %vm1628_vm8, %v1939_v20, %v1625_v39 }
0x133e   :  { %1944 = vrcp.f32 %v1640_v41  ;;  %v1634_v25 = vsel %vm1631_vm9, %v1633_v19, %v1629_v43  ;;  %v1652_v29 = vand.u32 2147483648, %v1640_v41  ;;  %v1650_v12 = vand.u32 2147483647, %v1640_v41 }
0x133f   :  { %v1656_v27 = vmul.f32 %v1943_v26, %v1634_v25  ;;  %vm1646_vm3 = vweird.f32 %v1640_v41 }
0x1340   :  { %v1653_v34 = vor.u32 1.1754944e-38, %v1652_v29  ;;  %vm1651_vm5 = vcmp.eq.f32.partialorder %v1650_v12, 8.507059e+37 }
0x1341   :  { %1946 = vtanh.f32 %v1656_v27 }
0x1344   :  { %v1945_v3 = vpop.eup %1944 }
0x1345   :  { %v1642_v15 = vmul.f32 %v1945_v3, %v1640_v41  ;;  %vm1647_vm2 = vweird.f32 %v1945_v3 }
0x1346   :  { %vm1648_vm4 = vmor %vm1646_vm3, %vm1647_vm2 }
0x1347   :  { %v1643_v28 = vsub.f32 1.0, %v1642_v15  ;;  %v1947_v53 = vpop.eup %1946 }
0x1349   :  { %v1644_v16 = vmul.f32 %v1945_v3, %v1643_v28 }
0x134b   :  { %v1645_v32 = vadd.f32 %v1945_v3, %v1644_v16 }
0x134d   :  { %v1649_v30 = vsel %vm1648_vm4, %v1945_v3, %v1645_v32 }
0x134e   :  { %v1654_v31 = vsel %vm1651_vm5, %v1653_v34, %v1649_v30 }
0x134f   :  { %v1658_v42 = vmul.f32 %v1947_v53, %v1654_v31 }
0x1351   :  { %1822 = vst.msk [vmem:[%s2494_s9 + $0xc] sm:$0x3] %vm70_vm0, %v1658_v42 }

</bundles_post_ra>
